<compile_context>
chip_gen: v7x
topology: tpu7x:2x2x1
jax: 0.10.0
libtpu: 0.0.40
codegen_flags: <defaults>
</compile_context>

<pallas_src>
import math
from functools import partial

import jax
import jax.numpy as jnp
from jax import lax
from jax.experimental import pallas as pl
from jax.experimental.pallas import tpu as pltpu

EPS = 1e-5


# ----------------------------- in-kernel helpers -----------------------------

def _layernorm(x, gamma, beta):
    # biased variance (torch.var(..., unbiased=False)); rsqrt -> EUP, no divide
    mean = jnp.mean(x, axis=-1, keepdims=True)
    var = jnp.mean((x - mean) ** 2, axis=-1, keepdims=True)
    return gamma * ((x - mean) * lax.rsqrt(var + EPS)) + beta


def _gelu_exact(x):
    # nn.GELU() default = exact erf-based GELU
    return 0.5 * x * (1.0 + lax.erf(x * jnp.float32(1.0 / math.sqrt(2.0))))


# ------------------------------- Pallas kernel --------------------------------

def minigpt_kernel(x_ref,
                   g1_ref, b1_ref, wqkv_ref, wo_ref, bo_ref,
                   g2_ref, b2_ref, wf1_ref, bf1_ref, wf2_ref, bf2_ref,
                   gh_ref, bh_ref, wh_ref, bhv_ref,
                   o_ref, h_scr, *, num_heads, head_dim):
    """One grid step = one transformer layer for one batch element.

    grid = (B, L); the activation is carried in VMEM scratch `h_scr` across the
    inner (layer) axis; the LM head runs fused on the last layer step.
    """
    del head_dim  # shapes carry it
    layer = pl.program_id(1)
    H = num_heads

    @pl.when(layer == 0)
    def _():
        h_scr[...] = x_ref[...].astype(jnp.float32)

    h = h_scr[...]                                       # (N, D) f32 residual stream
    N = h.shape[0]

    # ---------------- pre-norm 1 + causal multi-head attention ----------------
    xn = _layernorm(h, g1_ref[...], b1_ref[...])
    xb = xn.astype(jnp.bfloat16)

    # Head-major fused QKV straight out of the MXU: (3H, N, hd).  The Q weight
    # columns already carry the 1/sqrt(hd) score scale (folded at prep time).
    # The lhs broadcast is a tiny major-axis copy at these dims; at real sizes
    # tile the QKV columns instead (see header notes).
    xg = jnp.broadcast_to(xb, (3 * H,) + xb.shape)       # (3H, N, D) bf16
    qkv = jnp.einsum('gnd,gdk->gnk', xg, wqkv_ref[...],
                     preferred_element_type=jnp.float32)  # (3H, N, hd) f32
    q3 = qkv[:H].astype(jnp.bfloat16)                    # major-axis slices only
    k3 = qkv[H:2 * H].astype(jnp.bfloat16)
    v3 = qkv[2 * H:].astype(jnp.bfloat16)

    # Causal mask generated in-kernel (VPU iota + cmp, no resident (N,N) block).
    # Finite large-negative instead of -inf so no NaN risk from -inf - (-inf).
    row = lax.broadcasted_iota(jnp.int32, (N, N), 0)
    col = lax.broadcasted_iota(jnp.int32, (N, N), 1)
    neg = jnp.float32(-1e30)

    # batched-over-heads scores / softmax / PV (single dot_general each)
    s = jnp.einsum('hnd,hmd->hnm', q3, k3, preferred_element_type=jnp.float32)
    s = jnp.where((col > row)[None, :, :], neg, s)
    s = s - jnp.max(s, axis=-1, keepdims=True)
    p = jnp.exp(s)
    p = p * pl.reciprocal(jnp.sum(p, axis=-1, keepdims=True), approx=True)
    # attention dropout: identity (eval mode)
    ctx = jnp.einsum('hnm,hmd->hnd', p.astype(jnp.bfloat16), v3,
                     preferred_element_type=jnp.float32)  # (H, N, hd) f32

    # Output projection: batched per-head (hd, D) blocks on the MXU, then a
    # single reduce over the leading head axis (bias added once).
    # TODO(synk): einsum('hnd,hde->ne') (head reduction inside the MXU) is a
    # two-contracting-dim dot_general that Mosaic cannot lower; restructure to
    # a (N, H*hd) ctx layout at real sizes instead.
    attn_h = jnp.einsum('hnd,hde->hne', ctx.astype(jnp.bfloat16), wo_ref[...],
                        preferred_element_type=jnp.float32)   # (H, N, D)
    attn = jnp.sum(attn_h, axis=0) + bo_ref[...]
    # out dropout: identity (eval mode)
    sub1 = h + attn

    # ------------------------- pre-norm 2 + feedforward ------------------------
    # At real D/F, tile this over F with an f32 accumulator (see header notes).
    xn2 = _layernorm(sub1, g2_ref[...], b2_ref[...])
    ff = jnp.dot(xn2.astype(jnp.bfloat16), wf1_ref[...],
                 preferred_element_type=jnp.float32) + bf1_ref[...]
    ff = _gelu_exact(ff)
    ff = jnp.dot(ff.astype(jnp.bfloat16), wf2_ref[...],
                 preferred_element_type=jnp.float32) + bf2_ref[...]
    # feedforward dropout: identity (eval mode)
    out = sub1 + ff
    h_scr[...] = out                                     # carry to next layer

    # --------------------- fused LM head on the last layer --------------------
    # Lane-dense: the vocab dim is padded to a multiple of 128 by the wrapper.
    @pl.when(layer == pl.num_programs(1) - 1)
    def _():
        hn = _layernorm(out, gh_ref[...], bh_ref[...])
        o_ref[...] = (jnp.dot(hn.astype(jnp.bfloat16), wh_ref[...],
                              preferred_element_type=jnp.float32)
                      + bhv_ref[...]).astype(o_ref.dtype)


# --------------------------------- wrappers -----------------------------------

def prepare_params(params, cfg):
    """One-time layout prep:
      - stack per-layer weights with a leading layer axis (streamed by the grid),
      - fuse Wq|Wk|Wv head-major as (L, 3H, D, hd) with the 1/sqrt(hd) score
        scale folded into the Q columns,
      - reshape Wo head-major (L, H, hd, D),
      - pre-transpose the weight-tied head and zero-pad the vocab dim to a
        multiple of 128 (lane-dense logits store),
      - cast all MXU weight operands to bfloat16 (biases / LN params stay f32).
    """
    D = cfg["embed_dim"]
    H = cfg["num_heads"]
    hd = D // H
    F = cfg["ff_dim"]
    V = cfg["vocab_size"]
    Vp = ((V + 127) // 128) * 128
    scale = 1.0 / math.sqrt(hd)
    layers = params["layers"]
    wdt = jnp.bfloat16

    def head_split(w):                       # (D, D) cols -> (H, D, hd) head-major
        return jnp.stack([w[:, i * hd:(i + 1) * hd] for i in range(H)], axis=0)

    def fused_qkv(wq, wk, wv):               # -> (3H, D, hd)
        return jnp.concatenate(
            [head_split(wq * scale), head_split(wk), head_split(wv)], axis=0)

    wh = jnp.pad(params["vocab_embedding"].T, ((0, 0), (0, Vp - V)))   # (D, Vp)
    bhv = jnp.pad(params["head_bias"], (0, Vp - V)).reshape(1, Vp)     # (1, Vp)

    return {
        "vocab_embedding": params["vocab_embedding"],          # f32, for the gather
        "positional_embedding": params["positional_embedding"],
        "g1":   jnp.stack([lp[0].reshape(1, D) for lp in layers]),            # (L,1,D)
        "b1":   jnp.stack([lp[1].reshape(1, D) for lp in layers]),
        "wqkv": jnp.stack([fused_qkv(lp[2], lp[3], lp[4])
                           for lp in layers]).astype(wdt),                    # (L,3H,D,hd)
        "wo":   jnp.stack([lp[5].reshape(H, hd, D)
                           for lp in layers]).astype(wdt),                    # (L,H,hd,D)
        "bo":   jnp.stack([lp[6].reshape(1, D) for lp in layers]),
        "g2":   jnp.stack([lp[7].reshape(1, D) for lp in layers]),
        "b2":   jnp.stack([lp[8].reshape(1, D) for lp in layers]),
        "wf1":  jnp.stack([lp[9] for lp in layers]).astype(wdt),              # (L,D,F)
        "bf1":  jnp.stack([lp[10].reshape(1, F) for lp in layers]),
        "wf2":  jnp.stack([lp[11] for lp in layers]).astype(wdt),             # (L,F,D)
        "bf2":  jnp.stack([lp[12].reshape(1, D) for lp in layers]),
        "gh":   params["prehead_gamma"].reshape(1, D),
        "bh":   params["prehead_beta"].reshape(1, D),
        "wh":   wh.astype(wdt),             # weight tying, transposed + padded once
        "bhv":  bhv,
        "vocab_padded": Vp,
    }


def minigpt_forward(tokens, packed, cfg):
    """Full MiniGPT forward: embedding gather in plain JAX (glue), then a single
    fused pallas_call for all transformer layers + LM head."""
    B, N = tokens.shape
    D = cfg["embed_dim"]
    H = cfg["num_heads"]
    hd = D // H
    F = cfg["ff_dim"]
    V = cfg["vocab_size"]
    L = cfg["num_layers"]
    Vp = packed["vocab_padded"]

    # token + learned positional embedding (gather is glue, outside the kernel)
    h0 = (jnp.take(packed["vocab_embedding"], tokens, axis=0)
          + packed["positional_embedding"][:N][None, :, :]).astype(jnp.float32)
    # embed dropout: identity (eval mode)

    def layer_spec(shape):
        # per-layer stacked weight: leading layer axis selected by grid index l
        return pl.BlockSpec((None,) + shape,
                            lambda b, l, _r=len(shape): (l,) + (0,) * _r)

    def const_spec(shape):
        # constant block: fetched once, stays VMEM-resident across the grid
        return pl.BlockSpec(shape, lambda b, l, _r=len(shape): (0,) * _r)

    kernel = partial(minigpt_kernel, num_heads=H, head_dim=hd)
    logits_padded = pl.pallas_call(
        kernel,
        out_shape=jax.ShapeDtypeStruct((B, N, Vp), jnp.float32),
        grid=(B, L),
        in_specs=[
            # embedded input (read only at layer 0; small enough to keep here)
            pl.BlockSpec((None, N, D), lambda b, l: (b, 0, 0)),
            layer_spec((1, D)), layer_spec((1, D)),               # ln1 gamma/beta
            layer_spec((3 * H, D, hd)),                           # fused Wqkv (head-major, bf16)
            layer_spec((H, hd, D)),                               # Wo (head-major, bf16)
            layer_spec((1, D)),                                   # bo
            layer_spec((1, D)), layer_spec((1, D)),               # ln2 gamma/beta
            layer_spec((D, F)), layer_spec((1, F)),               # fc1 W(bf16), b
            layer_spec((F, D)), layer_spec((1, D)),               # fc2 W(bf16), b
            const_spec((1, D)), const_spec((1, D)),               # prehead ln
            const_spec((D, Vp)), const_spec((1, Vp)),             # tied head W^T (padded), bias
        ],
        out_specs=pl.BlockSpec((None, N, Vp), lambda b, l: (b, 0, 0)),  # lane-dense
        scratch_shapes=[pltpu.VMEM((N, D), jnp.float32)],         # resident activation
        compiler_params=pltpu.CompilerParams(
            dimension_semantics=("parallel", "arbitrary"),        # batch ∥ layers seq
            vmem_limit_bytes=32 * 1024 * 1024),
    )(h0,
      packed["g1"], packed["b1"], packed["wqkv"], packed["wo"], packed["bo"],
      packed["g2"], packed["b2"], packed["wf1"], packed["bf1"],
      packed["wf2"], packed["bf2"],
      packed["gh"], packed["bh"], packed["wh"], packed["bhv"])
    return logits_padded[..., :V]


# ---------------------------- pure-JAX reference ------------------------------

def ref_forward(tokens, params, cfg):
    B, N = tokens.shape
    D = cfg["embed_dim"]
    hd = D // cfg["num_heads"]
    h = jnp.take(params["vocab_embedding"], tokens, axis=0) + \
        params["positional_embedding"][:N][None, :, :]

    def ln(x, g, b):
        m = jnp.mean(x, axis=-1, keepdims=True)
        var = jnp.mean((x - m) ** 2, axis=-1, keepdims=True)
        return g * (x - m) / jnp.sqrt(var + EPS) + b

    for (g1, be1, wq, wk, wv, wo, bo, g2, be2, wf1, bf1, wf2, bf2) in params["layers"]:
        xn = ln(h, g1, be1)
        q, k, v = xn @ wq, xn @ wk, xn @ wv
        mask = jnp.where(jnp.triu(jnp.ones((N, N), bool), 1), -jnp.inf, 0.0)
        outs = []
        for i in range(cfg["num_heads"]):
            sl = slice(i * hd, (i + 1) * hd)
            s = q[..., sl] @ jnp.swapaxes(k[..., sl], -1, -2) / math.sqrt(hd) + mask
            outs.append(jax.nn.softmax(s, axis=-1) @ v[..., sl])
        attn = jnp.concatenate(outs, axis=-1) @ wo + bo
        sub1 = h + attn
        xn2 = ln(sub1, g2, be2)
        f = jax.nn.gelu(xn2 @ wf1 + bf1, approximate=False) @ wf2 + bf2
        h = sub1 + f
    h = ln(h, params["prehead_gamma"], params["prehead_beta"])
    return h @ params["vocab_embedding"].T + params["head_bias"]


# --------------------------------- init ----------------------------------------

def init_params(key, cfg):
    D, F, V, L = cfg["embed_dim"], cfg["ff_dim"], cfg["vocab_size"], cfg["context_length"]
    n_layers = cfg["num_layers"]
    std = 0.02
    std_fc2 = 0.02 / math.sqrt(2 * n_layers)

    keys = jax.random.split(key, 3 + 7 * n_layers)
    ki = iter(keys)

    params = {
        "vocab_embedding": std * jax.random.normal(next(ki), (V, D), jnp.float32),
        "positional_embedding": std * jax.random.normal(next(ki), (L, D), jnp.float32),
        "prehead_gamma": jnp.ones((D,), jnp.float32),
        "prehead_beta": jnp.zeros((D,), jnp.float32),
        "head_bias": jnp.zeros((V,), jnp.float32),   # weight-tied head, bias init to 0
        "layers": [],
    }
    _ = next(ki)  # spare key (kept for deterministic layout)

    for _l in range(n_layers):
        layer = (
            jnp.ones((D,), jnp.float32),                                   # gamma1
            jnp.zeros((D,), jnp.float32),                                  # beta1
            std * jax.random.normal(next(ki), (D, D), jnp.float32),        # Wq (in,out)
            std * jax.random.normal(next(ki), (D, D), jnp.float32),        # Wk
            std * jax.random.normal(next(ki), (D, D), jnp.float32),        # Wv
            std * jax.random.normal(next(ki), (D, D), jnp.float32),        # Wo
            jnp.zeros((D,), jnp.float32),                                  # bo
            jnp.ones((D,), jnp.float32),                                   # gamma2
            jnp.zeros((D,), jnp.float32),                                  # beta2
            std * jax.random.normal(next(ki), (D, F), jnp.float32),        # W_fc1
            jnp.zeros((F,), jnp.float32),                                  # b_fc1
            std_fc2 * jax.random.normal(next(ki), (F, D), jnp.float32),    # W_fc2
            jnp.zeros((D,), jnp.float32),                                  # b_fc2
        )
        params["layers"].append(layer)
        _ = next(ki)  # spare key per layer
    return params


# ---------------------------------- main ---------------------------------------

if __name__ == "__main__":
    cfg = {
        "vocab_size": 64,
        "context_length": 16,
        "embed_dim": 32,
        "num_heads": 4,
        "ff_dim": 128,       # feedforward_size=None -> 4 * embed_dim
        "num_layers": 2,
    }
    B, N = 2, 8

    root = jax.random.PRNGKey(0)
    k_param, k_tok = jax.random.split(root)
    params = init_params(k_param, cfg)
    packed = prepare_params(params, cfg)           # one-time layout prep
    tokens = jax.random.randint(k_tok, (B, N), 0, cfg["vocab_size"], dtype=jnp.int32)

    logits = minigpt_forward(tokens, packed, cfg)
    logits = jax.block_until_ready(logits)
    assert logits.shape == (B, N, cfg["vocab_size"])

    # Tolerance accounts for bf16 MXU operands (f32 accumulation) vs f32 ref.
    ref = ref_forward(tokens, params, cfg)
    assert jnp.allclose(logits, ref, atol=1e-2, rtol=1e-2), "mismatch vs reference"

    print("KERNEL_OK")
</pallas_src>

<mosaic_0001>
module attributes {stable_mosaic.version = 11 : i64} {
  func.func @minigpt_kernel(%arg0: i32, %arg1: i32, %arg2: memref<1x8x32xf32, #tpu.memory_space<vmem>>, %arg3: memref<1x1x32xf32, #tpu.memory_space<vmem>>, %arg4: memref<1x1x32xf32, #tpu.memory_space<vmem>>, %arg5: memref<1x12x32x8xbf16, #tpu.memory_space<vmem>>, %arg6: memref<1x4x8x32xbf16, #tpu.memory_space<vmem>>, %arg7: memref<1x1x32xf32, #tpu.memory_space<vmem>>, %arg8: memref<1x1x32xf32, #tpu.memory_space<vmem>>, %arg9: memref<1x1x32xf32, #tpu.memory_space<vmem>>, %arg10: memref<1x32x128xbf16, #tpu.memory_space<vmem>>, %arg11: memref<1x1x128xf32, #tpu.memory_space<vmem>>, %arg12: memref<1x128x32xbf16, #tpu.memory_space<vmem>>, %arg13: memref<1x1x32xf32, #tpu.memory_space<vmem>>, %arg14: memref<1x32xf32, #tpu.memory_space<vmem>>, %arg15: memref<1x32xf32, #tpu.memory_space<vmem>>, %arg16: memref<32x128xbf16, #tpu.memory_space<vmem>>, %arg17: memref<1x128xf32, #tpu.memory_space<vmem>>, %arg18: memref<1x8x128xf32, #tpu.memory_space<vmem>>, %arg19: memref<8x32xf32, #tpu.memory_space<vmem>>) attributes {dimension_semantics = [#tpu.dimension_semantics<parallel>, #tpu.dimension_semantics<arbitrary>], iteration_bounds = array<i64: 2, 2>, scalar_prefetch = 0 : i64, scratch_operands = 1 : i64, tpu.core_type = #tpu.core_type<tc>, window_params = [{transform_indices = @transform_0, window_bounds = array<i64: 1, 8, 32>}, {transform_indices = @transform_1, window_bounds = array<i64: 1, 1, 32>}, {transform_indices = @transform_2, window_bounds = array<i64: 1, 1, 32>}, {transform_indices = @transform_3, window_bounds = array<i64: 1, 12, 32, 8>}, {transform_indices = @transform_4, window_bounds = array<i64: 1, 4, 8, 32>}, {transform_indices = @transform_5, window_bounds = array<i64: 1, 1, 32>}, {transform_indices = @transform_6, window_bounds = array<i64: 1, 1, 32>}, {transform_indices = @transform_7, window_bounds = array<i64: 1, 1, 32>}, {transform_indices = @transform_8, window_bounds = array<i64: 1, 32, 128>}, {transform_indices = @transform_9, window_bounds = array<i64: 1, 1, 128>}, {transform_indices = @transform_10, window_bounds = array<i64: 1, 128, 32>}, {transform_indices = @transform_11, window_bounds = array<i64: 1, 1, 32>}, {pipeline_mode = #tpu.pipeline_mode<synchronous>, transform_indices = @transform_12, window_bounds = array<i64: 1, 32>}, {pipeline_mode = #tpu.pipeline_mode<synchronous>, transform_indices = @transform_13, window_bounds = array<i64: 1, 32>}, {pipeline_mode = #tpu.pipeline_mode<synchronous>, transform_indices = @transform_14, window_bounds = array<i64: 32, 128>}, {pipeline_mode = #tpu.pipeline_mode<synchronous>, transform_indices = @transform_15, window_bounds = array<i64: 1, 128>}, {transform_indices = @transform_16, window_bounds = array<i64: 1, 8, 128>}]} {
    %c0_i32 = arith.constant 0 : i32
    %0 = arith.cmpi eq, %arg1, %c0_i32 : i32
    %1 = arith.extui %0 : i1 to i32
    %c0_i32_0 = arith.constant 0 : i32
    %2 = arith.cmpi ne, %1, %c0_i32_0 : i32
    scf.if %2 {
      %c0_62 = arith.constant 0 : index
      %c0_63 = arith.constant 0 : index
      %c0_64 = arith.constant 0 : index
      %128 = vector.load %arg2[%c0_62, %c0_63, %c0_64] : memref<1x8x32xf32, #tpu.memory_space<vmem>>, vector<1x8x32xf32>
      %129 = vector.shape_cast %128 : vector<1x8x32xf32> to vector<8x32xf32>
      %c0_65 = arith.constant 0 : index
      %c0_66 = arith.constant 0 : index
      %130 = vector.load %arg19[%c0_65, %c0_66] : memref<8x32xf32, #tpu.memory_space<vmem>>, vector<8x32xf32>
      tpu.vector_store %arg19[%c0_65, %c0_66], %129 {strides = array<i32>} : memref<8x32xf32, #tpu.memory_space<vmem>>, vector<8x32xf32>,
    } else {
    }
    %c0 = arith.constant 0 : index
    %c0_1 = arith.constant 0 : index
    %3 = vector.load %arg19[%c0, %c0_1] : memref<8x32xf32, #tpu.memory_space<vmem>>, vector<8x32xf32>
    %c0_2 = arith.constant 0 : index
    %c0_3 = arith.constant 0 : index
    %c0_4 = arith.constant 0 : index
    %4 = vector.load %arg3[%c0_2, %c0_3, %c0_4] : memref<1x1x32xf32, #tpu.memory_space<vmem>>, vector<1x1x32xf32>
    %5 = vector.shape_cast %4 : vector<1x1x32xf32> to vector<1x32xf32>
    %c0_5 = arith.constant 0 : index
    %c0_6 = arith.constant 0 : index
    %c0_7 = arith.constant 0 : index
    %6 = vector.load %arg4[%c0_5, %c0_6, %c0_7] : memref<1x1x32xf32, #tpu.memory_space<vmem>>, vector<1x1x32xf32>
    %7 = vector.shape_cast %6 : vector<1x1x32xf32> to vector<1x32xf32>
    %cst = arith.constant dense<0.000000e+00> : vector<8xf32>
    %8 = vector.multi_reduction <add>, %3, %cst [1] : vector<8x32xf32> to vector<8xf32>
    %9 = vector.shape_cast %8 : vector<8xf32> to vector<8x1xf32>
    %cst_8 = arith.constant 3.200000e+01 : f32
    %10 = vector.broadcast %cst_8 : f32 to vector<8x1xf32>
    %11 = arith.divf %9, %10 : vector<8x1xf32>
    %12 = vector.broadcast %11 : vector<8x1xf32> to vector<8x32xf32>
    %13 = arith.subf %3, %12 : vector<8x32xf32>
    %14 = arith.mulf %13, %13 : vector<8x32xf32>
    %cst_9 = arith.constant dense<0.000000e+00> : vector<8xf32>
    %15 = vector.multi_reduction <add>, %14, %cst_9 [1] : vector<8x32xf32> to vector<8xf32>
    %16 = vector.shape_cast %15 : vector<8xf32> to vector<8x1xf32>
    %cst_10 = arith.constant 3.200000e+01 : f32
    %17 = vector.broadcast %cst_10 : f32 to vector<8x1xf32>
    %18 = arith.divf %16, %17 : vector<8x1xf32>
    %19 = vector.broadcast %11 : vector<8x1xf32> to vector<8x32xf32>
    %20 = arith.subf %3, %19 : vector<8x32xf32>
    %cst_11 = arith.constant 9.99999974E-6 : f32
    %21 = vector.broadcast %cst_11 : f32 to vector<8x1xf32>
    %22 = arith.addf %18, %21 : vector<8x1xf32>
    %23 = math.rsqrt %22 : vector<8x1xf32>
    %24 = vector.broadcast %23 : vector<8x1xf32> to vector<8x32xf32>
    %25 = arith.mulf %20, %24 : vector<8x32xf32>
    %26 = vector.broadcast %5 : vector<1x32xf32> to vector<8x32xf32>
    %27 = arith.mulf %26, %25 : vector<8x32xf32>
    %28 = vector.broadcast %7 : vector<1x32xf32> to vector<8x32xf32>
    %29 = arith.addf %27, %28 : vector<8x32xf32>
    %30 = arith.truncf %29 : vector<8x32xf32> to vector<8x32xbf16>
    %31 = vector.shape_cast %30 : vector<8x32xbf16> to vector<1x8x32xbf16>
    %32 = vector.broadcast %31 : vector<1x8x32xbf16> to vector<12x8x32xbf16>
    %c0_12 = arith.constant 0 : index
    %c0_13 = arith.constant 0 : index
    %c0_14 = arith.constant 0 : index
    %c0_15 = arith.constant 0 : index
    %33 = vector.load %arg5[%c0_12, %c0_13, %c0_14, %c0_15] : memref<1x12x32x8xbf16, #tpu.memory_space<vmem>>, vector<1x12x32x8xbf16>
    %34 = vector.shape_cast %33 : vector<1x12x32x8xbf16> to vector<12x32x8xbf16>
    "tpu.trace_start"() <{level = 10 : i32, message = "gnd,gdk->gnk"}> : () -> ()
    %cst_16 = arith.constant dense<0.000000e+00> : vector<12x8x8xf32>
    %35 = tpu.matmul %32, %34, %cst_16 {dimension_numbers = #tpu.dot_dimension_numbers<[2], [1], [1], [2], [0, 0, 0, 1, 1, 2], [0], [0]>} : vector<12x8x32xbf16>, vector<12x32x8xbf16>, vector<12x8x8xf32> -> vector<12x8x8xf32>
    "tpu.trace_stop"() : () -> ()
    %36 = vector.extract_strided_slice %35 {offsets = [0, 0, 0], sizes = [4, 8, 8], strides = [1, 1, 1]} : vector<12x8x8xf32> to vector<4x8x8xf32>
    %37 = arith.truncf %36 : vector<4x8x8xf32> to vector<4x8x8xbf16>
    %38 = vector.extract_strided_slice %35 {offsets = [4, 0, 0], sizes = [4, 8, 8], strides = [1, 1, 1]} : vector<12x8x8xf32> to vector<4x8x8xf32>
    %39 = arith.truncf %38 : vector<4x8x8xf32> to vector<4x8x8xbf16>
    %40 = vector.extract_strided_slice %35 {offsets = [8, 0, 0], sizes = [4, 8, 8], strides = [1, 1, 1]} : vector<12x8x8xf32> to vector<4x8x8xf32>
    %41 = arith.truncf %40 : vector<4x8x8xf32> to vector<4x8x8xbf16>
    %42 = tpu.iota {dimensions = array<i32: 0>} : vector<8x8xi32>
    %43 = tpu.iota {dimensions = array<i32: 1>} : vector<8x8xi32>
    "tpu.trace_start"() <{level = 10 : i32, message = "hnd,hmd->hnm"}> : () -> ()
    %cst_17 = arith.constant dense<0.000000e+00> : vector<4x8x8xf32>
    %44 = tpu.matmul %37, %39, %cst_17 {dimension_numbers = #tpu.dot_dimension_numbers<[2], [2], [1], [1], [0, 0, 0, 1, 1, 1], [0], [0]>} : vector<4x8x8xbf16>, vector<4x8x8xbf16>, vector<4x8x8xf32> -> vector<4x8x8xf32>
    "tpu.trace_stop"() : () -> ()
    %45 = arith.cmpi sgt, %43, %42 : vector<8x8xi32>
    %46 = vector.shape_cast %45 : vector<8x8xi1> to vector<1x8x8xi1>
    %cst_18 = arith.constant -1.000000e+30 : f32
    %47 = vector.shape_cast %46 : vector<1x8x8xi1> to vector<1x8x8xi1>
    %48 = vector.broadcast %47 : vector<1x8x8xi1> to vector<4x8x8xi1>
    %49 = vector.broadcast %cst_18 : f32 to vector<4x8x8xf32>
    %50 = arith.select %48, %49, %44 : vector<4x8x8xi1>, vector<4x8x8xf32>
    %cst_19 = arith.constant dense<0xFF800000> : vector<4x8xf32>
    %51 = vector.multi_reduction <maximumf>, %50, %cst_19 [2] : vector<4x8x8xf32> to vector<4x8xf32>
    %52 = vector.shape_cast %51 : vector<4x8xf32> to vector<4x8x1xf32>
    %53 = vector.broadcast %52 : vector<4x8x1xf32> to vector<4x8x8xf32>
    %54 = arith.subf %50, %53 : vector<4x8x8xf32>
    %55 = math.exp %54 : vector<4x8x8xf32>
    %cst_20 = arith.constant dense<0.000000e+00> : vector<4x8xf32>
    %56 = vector.multi_reduction <add>, %55, %cst_20 [2] : vector<4x8x8xf32> to vector<4x8xf32>
    %57 = vector.shape_cast %56 : vector<4x8xf32> to vector<4x8x1xf32>
    %58 = tpu.reciprocal %57 {approx = true} : vector<4x8x1xf32> -> vector<4x8x1xf32>
    %59 = vector.broadcast %58 : vector<4x8x1xf32> to vector<4x8x8xf32>
    %60 = arith.mulf %55, %59 : vector<4x8x8xf32>
    %61 = arith.truncf %60 : vector<4x8x8xf32> to vector<4x8x8xbf16>
    "tpu.trace_start"() <{level = 10 : i32, message = "hnm,hmd->hnd"}> : () -> ()
    %cst_21 = arith.constant dense<0.000000e+00> : vector<4x8x8xf32>
    %62 = tpu.matmul %61, %41, %cst_21 {dimension_numbers = #tpu.dot_dimension_numbers<[2], [1], [1], [2], [0, 0, 0, 1, 1, 2], [0], [0]>} : vector<4x8x8xbf16>, vector<4x8x8xbf16>, vector<4x8x8xf32> -> vector<4x8x8xf32>
    "tpu.trace_stop"() : () -> ()
    %63 = arith.truncf %62 : vector<4x8x8xf32> to vector<4x8x8xbf16>
    %c0_22 = arith.constant 0 : index
    %c0_23 = arith.constant 0 : index
    %c0_24 = arith.constant 0 : index
    %c0_25 = arith.constant 0 : index
    %64 = vector.load %arg6[%c0_22, %c0_23, %c0_24, %c0_25] : memref<1x4x8x32xbf16, #tpu.memory_space<vmem>>, vector<1x4x8x32xbf16>
    %65 = vector.shape_cast %64 : vector<1x4x8x32xbf16> to vector<4x8x32xbf16>
    "tpu.trace_start"() <{level = 10 : i32, message = "hnd,hde->hne"}> : () -> ()
    %cst_26 = arith.constant dense<0.000000e+00> : vector<4x8x32xf32>
    %66 = tpu.matmul %63, %65, %cst_26 {dimension_numbers = #tpu.dot_dimension_numbers<[2], [1], [1], [2], [0, 0, 0, 1, 1, 2], [0], [0]>} : vector<4x8x8xbf16>, vector<4x8x32xbf16>, vector<4x8x32xf32> -> vector<4x8x32xf32>
    "tpu.trace_stop"() : () -> ()
    %cst_27 = arith.constant dense<0.000000e+00> : vector<8x32xf32>
    %67 = vector.multi_reduction <add>, %66, %cst_27 [0] : vector<4x8x32xf32> to vector<8x32xf32>
    %c0_28 = arith.constant 0 : index
    %c0_29 = arith.constant 0 : index
    %c0_30 = arith.constant 0 : index
    %68 = vector.load %arg7[%c0_28, %c0_29, %c0_30] : memref<1x1x32xf32, #tpu.memory_space<vmem>>, vector<1x1x32xf32>
    %69 = vector.shape_cast %68 : vector<1x1x32xf32> to vector<1x32xf32>
    %70 = vector.broadcast %69 : vector<1x32xf32> to vector<8x32xf32>
    %71 = arith.addf %67, %70 : vector<8x32xf32>
    %72 = arith.addf %3, %71 : vector<8x32xf32>
    %c0_31 = arith.constant 0 : index
    %c0_32 = arith.constant 0 : index
    %c0_33 = arith.constant 0 : index
    %73 = vector.load %arg8[%c0_31, %c0_32, %c0_33] : memref<1x1x32xf32, #tpu.memory_space<vmem>>, vector<1x1x32xf32>
    %74 = vector.shape_cast %73 : vector<1x1x32xf32> to vector<1x32xf32>
    %c0_34 = arith.constant 0 : index
    %c0_35 = arith.constant 0 : index
    %c0_36 = arith.constant 0 : index
    %75 = vector.load %arg9[%c0_34, %c0_35, %c0_36] : memref<1x1x32xf32, #tpu.memory_space<vmem>>, vector<1x1x32xf32>
    %76 = vector.shape_cast %75 : vector<1x1x32xf32> to vector<1x32xf32>
    %cst_37 = arith.constant dense<0.000000e+00> : vector<8xf32>
    %77 = vector.multi_reduction <add>, %72, %cst_37 [1] : vector<8x32xf32> to vector<8xf32>
    %78 = vector.shape_cast %77 : vector<8xf32> to vector<8x1xf32>
    %cst_38 = arith.constant 3.200000e+01 : f32
    %79 = vector.broadcast %cst_38 : f32 to vector<8x1xf32>
    %80 = arith.divf %78, %79 : vector<8x1xf32>
    %81 = vector.broadcast %80 : vector<8x1xf32> to vector<8x32xf32>
    %82 = arith.subf %72, %81 : vector<8x32xf32>
    %83 = arith.mulf %82, %82 : vector<8x32xf32>
    %cst_39 = arith.constant dense<0.000000e+00> : vector<8xf32>
    %84 = vector.multi_reduction <add>, %83, %cst_39 [1] : vector<8x32xf32> to vector<8xf32>
    %85 = vector.shape_cast %84 : vector<8xf32> to vector<8x1xf32>
    %cst_40 = arith.constant 3.200000e+01 : f32
    %86 = vector.broadcast %cst_40 : f32 to vector<8x1xf32>
    %87 = arith.divf %85, %86 : vector<8x1xf32>
    %88 = vector.broadcast %80 : vector<8x1xf32> to vector<8x32xf32>
    %89 = arith.subf %72, %88 : vector<8x32xf32>
    %cst_41 = arith.constant 9.99999974E-6 : f32
    %90 = vector.broadcast %cst_41 : f32 to vector<8x1xf32>
    %91 = arith.addf %87, %90 : vector<8x1xf32>
    %92 = math.rsqrt %91 : vector<8x1xf32>
    %93 = vector.broadcast %92 : vector<8x1xf32> to vector<8x32xf32>
    %94 = arith.mulf %89, %93 : vector<8x32xf32>
    %95 = vector.broadcast %74 : vector<1x32xf32> to vector<8x32xf32>
    %96 = arith.mulf %95, %94 : vector<8x32xf32>
    %97 = vector.broadcast %76 : vector<1x32xf32> to vector<8x32xf32>
    %98 = arith.addf %96, %97 : vector<8x32xf32>
    %99 = arith.truncf %98 : vector<8x32xf32> to vector<8x32xbf16>
    %c0_42 = arith.constant 0 : index
    %c0_43 = arith.constant 0 : index
    %c0_44 = arith.constant 0 : index
    %100 = vector.load %arg10[%c0_42, %c0_43, %c0_44] : memref<1x32x128xbf16, #tpu.memory_space<vmem>>, vector<1x32x128xbf16>
    %101 = vector.shape_cast %100 : vector<1x32x128xbf16> to vector<32x128xbf16>
    %cst_45 = arith.constant dense<0.000000e+00> : vector<8x128xf32>
    %102 = tpu.matmul %99, %101, %cst_45 {dimension_numbers = #tpu.dot_dimension_numbers<[1], [0], [0], [1], [0, 0, 1, 1], [], []>} : vector<8x32xbf16>, vector<32x128xbf16>, vector<8x128xf32> -> vector<8x128xf32>
    %c0_46 = arith.constant 0 : index
    %c0_47 = arith.constant 0 : index
    %c0_48 = arith.constant 0 : index
    %103 = vector.load %arg11[%c0_46, %c0_47, %c0_48] : memref<1x1x128xf32, #tpu.memory_space<vmem>>, vector<1x1x128xf32>
    %104 = vector.shape_cast %103 : vector<1x1x128xf32> to vector<1x128xf32>
    %105 = vector.broadcast %104 : vector<1x128xf32> to vector<8x128xf32>
    %106 = arith.addf %102, %105 : vector<8x128xf32>
    %cst_49 = arith.constant 5.000000e-01 : f32
    %107 = vector.broadcast %cst_49 : f32 to vector<8x128xf32>
    %108 = arith.mulf %107, %106 : vector<8x128xf32>
    %cst_50 = arith.constant 0.707106769 : f32
    %109 = vector.broadcast %cst_50 : f32 to vector<8x128xf32>
    %110 = arith.mulf %106, %109 : vector<8x128xf32>
    %111 = math.erf %110 : vector<8x128xf32>
    %cst_51 = arith.constant 1.000000e+00 : f32
    %112 = vector.broadcast %cst_51 : f32 to vector<8x128xf32>
    %113 = arith.addf %112, %111 : vector<8x128xf32>
    %114 = arith.mulf %108, %113 : vector<8x128xf32>
    %115 = arith.truncf %114 : vector<8x128xf32> to vector<8x128xbf16>
    %c0_52 = arith.constant 0 : index
    %c0_53 = arith.constant 0 : index
    %c0_54 = arith.constant 0 : index
    %116 = vector.load %arg12[%c0_52, %c0_53, %c0_54] : memref<1x128x32xbf16, #tpu.memory_space<vmem>>, vector<1x128x32xbf16>
    %117 = vector.shape_cast %116 : vector<1x128x32xbf16> to vector<128x32xbf16>
    %cst_55 = arith.constant dense<0.000000e+00> : vector<8x32xf32>
    %118 = tpu.matmul %115, %117, %cst_55 {dimension_numbers = #tpu.dot_dimension_numbers<[1], [0], [0], [1], [0, 0, 1, 1], [], []>} : vector<8x128xbf16>, vector<128x32xbf16>, vector<8x32xf32> -> vector<8x32xf32>
    %c0_56 = arith.constant 0 : index
    %c0_57 = arith.constant 0 : index
    %c0_58 = arith.constant 0 : index
    %119 = vector.load %arg13[%c0_56, %c0_57, %c0_58] : memref<1x1x32xf32, #tpu.memory_space<vmem>>, vector<1x1x32xf32>
    %120 = vector.shape_cast %119 : vector<1x1x32xf32> to vector<1x32xf32>
    %121 = vector.broadcast %120 : vector<1x32xf32> to vector<8x32xf32>
    %122 = arith.addf %118, %121 : vector<8x32xf32>
    %123 = arith.addf %72, %122 : vector<8x32xf32>
    %c0_59 = arith.constant 0 : index
    %c0_60 = arith.constant 0 : index
    %124 = vector.load %arg19[%c0_59, %c0_60] : memref<8x32xf32, #tpu.memory_space<vmem>>, vector<8x32xf32>
    tpu.vector_store %arg19[%c0_59, %c0_60], %123 {strides = array<i32>} : memref<8x32xf32, #tpu.memory_space<vmem>>, vector<8x32xf32>,
    %c1_i32 = arith.constant 1 : i32
    %125 = arith.cmpi eq, %arg1, %c1_i32 : i32
    %126 = arith.extui %125 : i1 to i32
    %c0_i32_61 = arith.constant 0 : i32
    %127 = arith.cmpi ne, %126, %c0_i32_61 : i32
    scf.if %127 {
      %c0_62 = arith.constant 0 : index
      %c0_63 = arith.constant 0 : index
      %128 = vector.load %arg14[%c0_62, %c0_63] : memref<1x32xf32, #tpu.memory_space<vmem>>, vector<1x32xf32>
      %c0_64 = arith.constant 0 : index
      %c0_65 = arith.constant 0 : index
      %129 = vector.load %arg15[%c0_64, %c0_65] : memref<1x32xf32, #tpu.memory_space<vmem>>, vector<1x32xf32>
      %cst_66 = arith.constant dense<0.000000e+00> : vector<8xf32>
      %130 = vector.multi_reduction <add>, %123, %cst_66 [1] : vector<8x32xf32> to vector<8xf32>
      %131 = vector.shape_cast %130 : vector<8xf32> to vector<8x1xf32>
      %cst_67 = arith.constant 3.200000e+01 : f32
      %132 = vector.broadcast %cst_67 : f32 to vector<8x1xf32>
      %133 = arith.divf %131, %132 : vector<8x1xf32>
      %134 = vector.broadcast %133 : vector<8x1xf32> to vector<8x32xf32>
      %135 = arith.subf %123, %134 : vector<8x32xf32>
      %136 = arith.mulf %135, %135 : vector<8x32xf32>
      %cst_68 = arith.constant dense<0.000000e+00> : vector<8xf32>
      %137 = vector.multi_reduction <add>, %136, %cst_68 [1] : vector<8x32xf32> to vector<8xf32>
      %138 = vector.shape_cast %137 : vector<8xf32> to vector<8x1xf32>
      %cst_69 = arith.constant 3.200000e+01 : f32
      %139 = vector.broadcast %cst_69 : f32 to vector<8x1xf32>
      %140 = arith.divf %138, %139 : vector<8x1xf32>
      %141 = vector.broadcast %133 : vector<8x1xf32> to vector<8x32xf32>
      %142 = arith.subf %123, %141 : vector<8x32xf32>
      %cst_70 = arith.constant 9.99999974E-6 : f32
      %143 = vector.broadcast %cst_70 : f32 to vector<8x1xf32>
      %144 = arith.addf %140, %143 : vector<8x1xf32>
      %145 = math.rsqrt %144 : vector<8x1xf32>
      %146 = vector.broadcast %145 : vector<8x1xf32> to vector<8x32xf32>
      %147 = arith.mulf %142, %146 : vector<8x32xf32>
      %148 = vector.broadcast %128 : vector<1x32xf32> to vector<8x32xf32>
      %149 = arith.mulf %148, %147 : vector<8x32xf32>
      %150 = vector.broadcast %129 : vector<1x32xf32> to vector<8x32xf32>
      %151 = arith.addf %149, %150 : vector<8x32xf32>
      %152 = arith.truncf %151 : vector<8x32xf32> to vector<8x32xbf16>
      %c0_71 = arith.constant 0 : index
      %c0_72 = arith.constant 0 : index
      %153 = vector.load %arg16[%c0_71, %c0_72] : memref<32x128xbf16, #tpu.memory_space<vmem>>, vector<32x128xbf16>
      %cst_73 = arith.constant dense<0.000000e+00> : vector<8x128xf32>
      %154 = tpu.matmul %152, %153, %cst_73 {dimension_numbers = #tpu.dot_dimension_numbers<[1], [0], [0], [1], [0, 0, 1, 1], [], []>} : vector<8x32xbf16>, vector<32x128xbf16>, vector<8x128xf32> -> vector<8x128xf32>
      %c0_74 = arith.constant 0 : index
      %c0_75 = arith.constant 0 : index
      %155 = vector.load %arg17[%c0_74, %c0_75] : memref<1x128xf32, #tpu.memory_space<vmem>>, vector<1x128xf32>
      %156 = vector.broadcast %155 : vector<1x128xf32> to vector<8x128xf32>
      %157 = arith.addf %154, %156 : vector<8x128xf32>
      %c0_76 = arith.constant 0 : index
      %c0_77 = arith.constant 0 : index
      %c0_78 = arith.constant 0 : index
      %158 = vector.load %arg18[%c0_76, %c0_77, %c0_78] : memref<1x8x128xf32, #tpu.memory_space<vmem>>, vector<1x8x128xf32>
      %159 = vector.shape_cast %158 : vector<1x8x128xf32> to vector<8x128xf32>
      %160 = vector.shape_cast %157 : vector<8x128xf32> to vector<1x8x128xf32>
      tpu.vector_store %arg18[%c0_76, %c0_77, %c0_78], %160 {strides = array<i32>} : memref<1x8x128xf32, #tpu.memory_space<vmem>>, vector<1x8x128xf32>,
    } else {
    }
    return
  }
  func.func @transform_0(%arg0: i32, %arg1: i32) -> (i32, i32, i32) {
    %c0_i32 = arith.constant 0 : i32
    %c0_i32_0 = arith.constant 0 : i32
    %c0_i32_1 = arith.constant 0 : i32
    return %arg0, %c0_i32, %c0_i32_0 : i32, i32, i32
  }
  func.func @transform_1(%arg0: i32, %arg1: i32) -> (i32, i32, i32) {
    %c0_i32 = arith.constant 0 : i32
    %c0_i32_0 = arith.constant 0 : i32
    %c0_i32_1 = arith.constant 0 : i32
    return %arg1, %c0_i32, %c0_i32_0 : i32, i32, i32
  }
  func.func @transform_2(%arg0: i32, %arg1: i32) -> (i32, i32, i32) {
    %c0_i32 = arith.constant 0 : i32
    %c0_i32_0 = arith.constant 0 : i32
    %c0_i32_1 = arith.constant 0 : i32
    return %arg1, %c0_i32, %c0_i32_0 : i32, i32, i32
  }
  func.func @transform_3(%arg0: i32, %arg1: i32) -> (i32, i32, i32, i32) {
    %c0_i32 = arith.constant 0 : i32
    %c0_i32_0 = arith.constant 0 : i32
    %c0_i32_1 = arith.constant 0 : i32
    %c0_i32_2 = arith.constant 0 : i32
    return %arg1, %c0_i32, %c0_i32_0, %c0_i32_1 : i32, i32, i32, i32
  }
  func.func @transform_4(%arg0: i32, %arg1: i32) -> (i32, i32, i32, i32) {
    %c0_i32 = arith.constant 0 : i32
    %c0_i32_0 = arith.constant 0 : i32
    %c0_i32_1 = arith.constant 0 : i32
    %c0_i32_2 = arith.constant 0 : i32
    return %arg1, %c0_i32, %c0_i32_0, %c0_i32_1 : i32, i32, i32, i32
  }
  func.func @transform_5(%arg0: i32, %arg1: i32) -> (i32, i32, i32) {
    %c0_i32 = arith.constant 0 : i32
    %c0_i32_0 = arith.constant 0 : i32
    %c0_i32_1 = arith.constant 0 : i32
    return %arg1, %c0_i32, %c0_i32_0 : i32, i32, i32
  }
  func.func @transform_6(%arg0: i32, %arg1: i32) -> (i32, i32, i32) {
    %c0_i32 = arith.constant 0 : i32
    %c0_i32_0 = arith.constant 0 : i32
    %c0_i32_1 = arith.constant 0 : i32
    return %arg1, %c0_i32, %c0_i32_0 : i32, i32, i32
  }
  func.func @transform_7(%arg0: i32, %arg1: i32) -> (i32, i32, i32) {
    %c0_i32 = arith.constant 0 : i32
    %c0_i32_0 = arith.constant 0 : i32
    %c0_i32_1 = arith.constant 0 : i32
    return %arg1, %c0_i32, %c0_i32_0 : i32, i32, i32
  }
  func.func @transform_8(%arg0: i32, %arg1: i32) -> (i32, i32, i32) {
    %c0_i32 = arith.constant 0 : i32
    %c0_i32_0 = arith.constant 0 : i32
    %c0_i32_1 = arith.constant 0 : i32
    return %arg1, %c0_i32, %c0_i32_0 : i32, i32, i32
  }
  func.func @transform_9(%arg0: i32, %arg1: i32) -> (i32, i32, i32) {
    %c0_i32 = arith.constant 0 : i32
    %c0_i32_0 = arith.constant 0 : i32
    %c0_i32_1 = arith.constant 0 : i32
    return %arg1, %c0_i32, %c0_i32_0 : i32, i32, i32
  }
  func.func @transform_10(%arg0: i32, %arg1: i32) -> (i32, i32, i32) {
    %c0_i32 = arith.constant 0 : i32
    %c0_i32_0 = arith.constant 0 : i32
    %c0_i32_1 = arith.constant 0 : i32
    return %arg1, %c0_i32, %c0_i32_0 : i32, i32, i32
  }
  func.func @transform_11(%arg0: i32, %arg1: i32) -> (i32, i32, i32) {
    %c0_i32 = arith.constant 0 : i32
    %c0_i32_0 = arith.constant 0 : i32
    %c0_i32_1 = arith.constant 0 : i32
    return %arg1, %c0_i32, %c0_i32_0 : i32, i32, i32
  }
  func.func @transform_12(%arg0: i32, %arg1: i32) -> (i32, i32) {
    %c0_i32 = arith.constant 0 : i32
    %c0_i32_0 = arith.constant 0 : i32
    %c0_i32_1 = arith.constant 0 : i32
    return %c0_i32, %c0_i32_0 : i32, i32
  }
  func.func @transform_13(%arg0: i32, %arg1: i32) -> (i32, i32) {
    %c0_i32 = arith.constant 0 : i32
    %c0_i32_0 = arith.constant 0 : i32
    %c0_i32_1 = arith.constant 0 : i32
    return %c0_i32, %c0_i32_0 : i32, i32
  }
  func.func @transform_14(%arg0: i32, %arg1: i32) -> (i32, i32) {
    %c0_i32 = arith.constant 0 : i32
    %c0_i32_0 = arith.constant 0 : i32
    %c0_i32_1 = arith.constant 0 : i32
    return %c0_i32, %c0_i32_0 : i32, i32
  }
  func.func @transform_15(%arg0: i32, %arg1: i32) -> (i32, i32) {
    %c0_i32 = arith.constant 0 : i32
    %c0_i32_0 = arith.constant 0 : i32
    %c0_i32_1 = arith.constant 0 : i32
    return %c0_i32, %c0_i32_0 : i32, i32
  }
  func.func @transform_16(%arg0: i32, %arg1: i32) -> (i32, i32, i32) {
    %c0_i32 = arith.constant 0 : i32
    %c0_i32_0 = arith.constant 0 : i32
    %c0_i32_1 = arith.constant 0 : i32
    return %arg0, %c0_i32, %c0_i32_0 : i32, i32, i32
  }
}

</mosaic_0001>

<bundles_post_ra>
// kernel: tpu_custom_call.1
= control target key start
LH: loop header
LB: loop body
LE: loop exit
PB: predicated region body
PF: predicated region fallthrough
CT: control target
= control target key end

     0   :  { %s3752_s0 = inlined_call_operand.vmem [shape: f32[2,8,32], index: 0, kind: input, shape index: {}]   ;;  %s3753_s1 = inlined_call_operand.vmem [shape: f32[2,1,32], index: 1, kind: input, shape index: {}]   ;;  %s3754_s2 = inlined_call_operand.vmem [shape: f32[2,1,32], index: 2, kind: input, shape index: {}]   ;;  %s3755_s3 = inlined_call_operand.vmem [shape: bf16[2,12,32,8], index: 3, kind: input, shape index: {}]   ;;  %s3756_s4 = inlined_call_operand.vmem [shape: bf16[2,4,8,32], index: 4, kind: input, shape index: {}]   ;;  %s3757_s5 = inlined_call_operand.vmem [shape: f32[2,1,32], index: 5, kind: input, shape index: {}]   ;;  %s3758_s6 = inlined_call_operand.vmem [shape: f32[2,1,32], index: 6, kind: input, shape index: {}]   ;;  %s3759_s7 = inlined_call_operand.vmem [shape: f32[2,1,32], index: 7, kind: input, shape index: {}]   ;;  %s3760_s8 = inlined_call_operand.vmem [shape: bf16[2,32,128], index: 8, kind: input, shape index: {}]   ;;  %s3761_s9 = inlined_call_operand.vmem [shape: f32[2,1,128], index: 9, kind: input, shape index: {}]   ;;  %s3762_s10 = inlined_call_operand.vmem [shape: bf16[2,128,32], index: 10, kind: input, shape index: {}]   ;;  %s3763_s11 = inlined_call_operand.vmem [shape: f32[2,1,32], index: 11, kind: input, shape index: {}]   ;;  %s3764_s12 = inlined_call_operand.vmem [shape: f32[1,32], index: 12, kind: input, shape index: {}]   ;;  %s3765_s13 = inlined_call_operand.vmem [shape: f32[1,32], index: 13, kind: input, shape index: {}]   ;;  %s3766_s14 = inlined_call_operand.vmem [shape: bf16[32,128], index: 14, kind: input, shape index: {}]   ;;  %s3767_s15 = inlined_call_operand.vmem [shape: f32[1,128], index: 15, kind: input, shape index: {}]   ;;  %s3768_s16 = inlined_call_operand.hbm [shape: f32[2,8,128], index: 16, kind: output, shape index: {}]  }
   0x1   :  { %3785 = sst [smem:[#allocation19_spill]] %s3752_s0 }
   0x2   :  { %3786 = sst [smem:[#allocation20_spill]] %s3755_s3 }
   0x3   :  { %3787 = sst [smem:[#allocation21_spill]] %s3756_s4 }
   0x4   :  { %3788 = sst [smem:[#allocation22_spill]] %s3764_s12 }
   0x5   :  { %3789 = sst [smem:[#allocation23_spill]] %s3765_s13 }
   0x6   :  { %3790 = sst [smem:[#allocation24_spill]] %s3766_s14 }
   0x7   :  { %3791 = sst [smem:[#allocation25_spill]] %s3767_s15 }
   0x8   :  { %3792 = sst [smem:[#allocation26_spill]] %s3768_s16 }
   0x9   :  { %21 = vsyncpa [#allocation4], 0 }
   0xa   :  { %23 = vsyncpa [#allocation4 + $0x1], 0  ;;  %s3279_s21 = smov 0   ;;  %s3281_s22 = smov 0  }
   0xb   :  { %s3283_s23 = smov 0   ;;  %s3285_s24 = smov 0  }
   0xc   :  { %s3287_s25 = smov 0   ;;  %s3289_s26 = smov 0  }
   0xd   :  { %s3291_s27 = smov 0   ;;  %s3293_s28 = smov 0  }
   0xe LB: > { %3793 = sst [smem:[#allocation6_spill]] %s3159_s21  ;;  %s2583_s29 = sadd.s32 4294967295, %s3187_s28   ;;  %s3187_s28 = sphi %s3293_s28, %s29_s28   ;;  %s3183_s27 = sphi %s3291_s27, %s3835_s27   ;;  %s3179_s26 = sphi %s3289_s26, %s3834_s26   ;;  %s3175_s25 = sphi %s3287_s25, %s3833_s25   ;;  %s3171_s24 = sphi %s3285_s24, %s3832_s24   ;;  %s3167_s23 = sphi %s3283_s23, %s3831_s23   ;;  %s3163_s22 = sphi %s3281_s22, %s3830_s22   ;;  %s3159_s21 = sphi %s3279_s21, %s3829_s21  }
   0xf   : > { %3794 = sst [smem:[#allocation7_spill]] %s3163_s22  ;;  %s2584_s30 = sadd.s32 4294967294, %s3187_s28  }
  0x10   : > { %3795 = sst [smem:[#allocation8_spill]] %s3167_s23  ;;  %s38_s0 = sadd.s32 1, %s3179_s26 }
  0x11   : > { %3796 = sst [smem:[#allocation9_spill]] %s3171_s24  ;;  %p39_p0 = scmp.ge.s32.totalorder %s38_s0, 2 }
  0x12   : > { %3797 = sst [smem:[#allocation10_spill]] %s3175_s25  ;;  %s41_s17 = sadd.s32 1, %s3183_s27 }
  0x13   : > { %3798 = sst [smem:[#allocation11_spill]] %s3179_s26  ;;  %p454_p1 = scmp.ne.s32.totalorder %s3167_s23, %s3163_s22 }
  0x14   : > { %3799 = sst [smem:[#allocation12_spill]] %s3183_s27  ;;  %p455_p2 = scmp.eq.s32.totalorder %s2583_s29, 3 }
  0x15   : > { %3800 = sst [smem:[#allocation13_spill]] %s3187_s28  ;;  %s3837_s0 = smov (%p39_p0, %s38_s0), 0 }
  0x16   : > { %3801 = sst [smem:[#allocation14_spill]] %s3837_s0  ;;  %s3839_s17 = smov (!%p39_p0, %s41_s17), %s3183_s27 }
  0x17   : > { %p3328_p3 = por %p455_p2, %p454_p1  ;;  %p460_p4 = scmp.ne.s32.totalorder %s3163_s22, %s3159_s21 }
  0x18   : > { %p43_p5 = scmp.ge.s32.totalorder %s3839_s17, 2  ;;  %p461_p6 = scmp.eq.s32.totalorder %s2584_s30, 3 }
  0x19   : > { %s3802_s18 = scalar_select %p3328_p3, 1, 0 }
  0x1a   : > { %p2587_p7 = scmp.ge.s32.totalorder %s3187_s28, 1  ;;  %p572_p8 = scmp.lt.s32.totalorder %s3187_s28, 5 }
  0x1b   : > { %3803 = sst [smem:[#allocation15_spill]] %s3802_s18  ;;  %s3841_s17 = smov (%p43_p5, %s3839_s17), 0 }
  0x1c   : > { %3804 = sst [smem:[#allocation16_spill]] %s3841_s17  ;;  %p3338_p9 = por %p461_p6, %p460_p4 }
  0x1d   : > { %p573_p10 = pnand %p2587_p7, %p572_p8  ;;  %s441_s20 = ssub.s32 %s3183_s27, %s3841_s17 }
  0x1e   : > { %s3805_s19 = scalar_select %p3338_p9, 1, 0 }
  0x1f   : > { %s444_s29 = sadd.s32 1, %s3167_s23  ;;  %p442_p11 = scmp.eq.s32.totalorder %s441_s20, 0 }
  0x20   : > { %3806 = sst [smem:[#allocation17_spill]] %s3805_s19  ;;  %576 = sbr.rel (%p573_p10) target bundleno = 2911 (0xb5f), region = 84 }
  0x21   : > { %s3346_s0 = scalar_select %p442_p11, %s3167_s23, %s444_s29  }
  0x22   : > { %s3774_s30 = sand.u32 (!%p573_p10), 1, %s3163_s22   ;;  %p662_p12 = scmp.lt.s32.totalorder (!%p573_p10), %s3175_s25, 1 }
  0x23   : > { %3807 = sst [smem:[#allocation18_spill]] %s3346_s0  ;;  %s3352_s26 = sshll.u32 (!%p573_p10), %s3774_s30, 3 }
  0x24   : > { %p666_p13 = scmp.lt.s32.totalorder (!%p573_p10), %s3171_s24, 1  ;;  %s3808_s27 = sld [smem:[#allocation19_spill]] (!%p573_p10) }
  0x25   : > { %s3809_s3 = sld [smem:[#allocation20_spill]] (!%p573_p10)  ;;  %s3810_s4 = sld [smem:[#allocation21_spill]] (!%p573_p10) }
  0x26   : > { %s661_s22 = scalar_lea.vmem (!%p573_p10), [#allocation3], %s3352_s26  ;;  %s3811_s18 = sld [smem:[#allocation9_spill]] (!%p573_p10) }
  0x27   : > { %s663_s19 = scalar_select %p662_p12, %s3175_s25, 1 }
  0x28   : > { %s3357_s21 = scalar_select %p666_p13, %s3171_s24, 1 }
  0x29   : > { %s2589_s20 = sshll.u32 %s663_s19, 3 }
  0x2a   : > { %s665_s30 = scalar_lea.vmem %s3808_s27, %s2589_s20  ;;  %s2957_s25 = smul.u32 192, %s3357_s21 }
  0x2b   : > { %s2675_s15 = sshll.u32 %s3357_s21, 4  ;;  %s690_s28 = scalar_lea.vmem %s3759_s7, %s3357_s21 }
  0x2c   : > { %s3379_s17 = scalar_lea.vmem %s3809_s3, %s2957_s25  ;;  %s3384_s23 = scalar_lea.vmem %s3810_s4, %s2675_s15 }
  0x2d   : > { %s3397_s14 = scalar_lea.vmem %s3760_s8, %s2675_s15  ;;  %s698_s19 = scalar_lea.vmem %s3761_s9, %s3357_s21 }
  0x2e   : > { %s2677_s27 = sshll.u32 %s3357_s21, 6  ;;  %s706_s4 = scalar_lea.vmem %s3763_s11, %s3357_s21 }
  0x2f   : > { %s3411_s16 = scalar_lea.vmem %s3762_s10, %s2677_s27  ;;  %p2597_p0 = scmp.ne.s32.totalorder %s3811_s18, 0 }
  0x30   : > { %v712_v0 = vld [vmem:[%s665_s30] sm:$0xff] (!%p2597_p0)  ;;  %vm713_vm0 = vcmask (!%p2597_p0), 261120  }
  0x31   : > { %711 = sbr.rel (%p2597_p0) target bundleno = 56 (0x38), region = 88  ;;  %714 = vst.msk [vmem:[#allocation2] sm:$0xff] (!%p2597_p0), %vm713_vm0, %v712_v0 }
  0x38 PF: > { %v3415_v1 = vld [vmem:[#allocation2] sm:$0xff]  ;;  %vm718_vm1 = vcmask 261120   ;;  %v3034_v9 = vld [vmem:[%s3379_s17 + $0x30] sm:$0xff]   ;;  %v3189_v10 = vmov 0.0   ;;  %v3035_v11 = vld [vmem:[%s3379_s17 + $0x8] sm:$0xff]   ;;  %vm3190_vm2 = vmmov 0   ;;  %s3812_s30 = scalar_lea.vmem %s3753_s1, %s3357_s21  ;;  %s3813_s24 = scalar_lea.vmem %s3754_s2, %s3357_s21 }
  0x39   : > { %v719_v2 = vsel %vm718_vm1, %v3415_v1, 0.0  ;;  %v3033_v8 = vld [vmem:[%s3379_s17] sm:$0xff]   ;;  %2753 = vmatprep.subr.bf16.mxu0 %v3189_v10  ;;  %2777 = vmatprep.subr.bf16.mxu1 %v3189_v10  ;;  %v3036_v12 = vld [vmem:[%s3379_s17 + $0x38] sm:$0xff]   ;;  %v3037_v22 = vld [vmem:[%s3379_s17 + $0x10] sm:$0xff]   ;;  %vm1439_vm3 = vcmask 64512   ;;  %vm1682_vm4 = vcmask 1043456   ;;  %s3814_s25 = scalar_lea.vmem %s3757_s5, %s3357_s21  ;;  %s3815_s20 = scalar_lea.vmem %s3758_s6, %s3357_s21 }
  0x3a   : > { %720 = vadd.xlane.f32.xlu0 %v719_v2  ;;  %2754 = vmatpush3.bf16.msra.mxu0 %v3033_v8  ;;  %v2598_v17 = vld [vmem:[%s3812_s30] ss:$0 sm:$0xff]  ;;  %v3038_v23 = vld [vmem:[%s3379_s17 + $0x50] sm:$0xff]   ;;  %v3039_v25 = vld [vmem:[%s3379_s17 + $0x18] sm:$0xff]  }
  0x3b   : > { %2778 = vmatpush3.bf16.msra.mxu1 %v3034_v9  ;;  %2755 = vmatprep.subr.bf16.mxu0 %v3189_v10  ;;  %v2599_v19 = vld [vmem:[%s3813_s24] ss:$0 sm:$0xff]  ;;  %v3040_v26 = vld [vmem:[%s3379_s17 + $0x58] sm:$0xff]   ;;  %v3042_v28 = vld [vmem:[%s3379_s17 + $0x70] sm:$0xff]  }
  0x3c   : > { %2779 = vmatprep.subr.bf16.mxu1 %v3189_v10  ;;  %2757 = vmatprep.mubr.msk.bf16.mxu0 %vm3190_vm2, %v3189_v10  ;;  %v3041_v27 = vld [vmem:[%s3379_s17 + $0x20] sm:$0xff]   ;;  %v3043_v29 = vld [vmem:[%s3379_s17 + $0x28] sm:$0xff]   ;;  %v3044_v30 = vld [vmem:[%s3379_s17 + $0x78] sm:$0xff]  }
  0x3d   : > { %2781 = vmatprep.mubr.msk.bf16.mxu1 %vm3190_vm2, %v3189_v10  ;;  %v3045_v31 = vld [vmem:[%s3379_s17 + $0x40] sm:$0xff]   ;;  %v3046_v32 = vld [vmem:[%s3379_s17 + $0x90] sm:$0xff]   ;;  %v3047_v33 = vld [vmem:[%s3379_s17 + $0x48] sm:$0xff]  }
  0x3e   : > { %2756 = vmatpush3.bf16.msra.mxu0 %v3035_v11  ;;  %v3048_v34 = vld [vmem:[%s3379_s17 + $0x98] sm:$0xff]   ;;  %v3049_v35 = vld [vmem:[%s3379_s17 + $0x60] sm:$0xff]   ;;  %v3050_v36 = vld [vmem:[%s3379_s17 + $0xb0] sm:$0xff]  }
  0x3f   : > { %2780 = vmatpush3.bf16.msra.mxu1 %v3036_v12  ;;  %2761 = vmatprep.subr.bf16.mxu0 %v3189_v10  ;;  %v3051_v37 = vld [vmem:[%s3379_s17 + $0x68] sm:$0xff]   ;;  %v3052_v38 = vld [vmem:[%s3379_s17 + $0xb8] sm:$0xff]   ;;  %v3053_v39 = vld [vmem:[%s3379_s17 + $0x80] sm:$0xff]  }
  0x40   : > { %2793 = vmatprep.subr.bf16.mxu1 %v3189_v10  ;;  %v3054_v40 = vld [vmem:[%s3379_s17 + $0x88] sm:$0xff]   ;;  %v3055_v41 = vld [vmem:[%s3379_s17 + $0xa0] sm:$0xff]  }
  0x41   : > { %v3056_v42 = vld [vmem:[%s3379_s17 + $0xa8] sm:$0xff]  }
  0xc7   : > { %v721_v3 = vpop.xlane.xlu0 %720 }
  0xc8   : > { %v723_v4 = vmul.f32 0.03125, %v721_v3 }
  0xca   : > { %v724_v5 = vsub.f32 %v3415_v1, %v723_v4 }
  0xcc   : > { %v725_v6 = vmul.f32 %v724_v5, %v724_v5 }
  0xce   : > { %v726_v7 = vsel %vm718_vm1, %v725_v6, 0.0 }
  0xcf   : > { %727 = vadd.xlane.f32.xlu0 %v726_v7 }
 0x15c   : > { %v728_v13 = vpop.xlane.xlu0 %727 }
 0x15d   : > { %v729_v14 = vmul.f32 0.03125, %v728_v13 }
 0x15f   : > { %v730_v15 = vadd.f32 1e-05, %v729_v14 }
 0x161   : > { %3067 = vrsqrt.f32 %v730_v15 }
 0x16b   : > { %v3068_v16 = vpop.eup %3067 }
 0x16c   : > { %v732_v18 = vmul.f32 %v3068_v16, %v724_v5 }
 0x16e   : > { %v739_v20 = vmul.f32 %v2598_v17, %v732_v18 }
 0x170   : > { %v746_v21 = vadd.f32 %v2599_v19, %v739_v20 }
 0x172   : > { %v3447_v24 = vpack.c.bf16 %v746_v21, %v746_v21 }
 0x174   : > { %2758 = vmatmul.mubr.msk.bf16.vlgmr.msra.gmra.mrb[0].mxu0 %vm718_vm1, %v3447_v24  ;;  %2782 = vmatmul.mubr.msk.bf16.vlgmr.msra.gmra.mrb[0].mxu1 %vm718_vm1, %v3447_v24 }
 0x175   : > { %2762 = vmatpush3.bf16.msra.mxu0 %v3037_v22  ;;  %2794 = vmatpush3.bf16.msra.mxu1 %v3038_v23 }
 0x176   : > { %2763 = vmatprep.subr.bf16.mxu0 %v3189_v10  ;;  %2795 = vmatprep.subr.bf16.mxu1 %v3189_v10 }
 0x177   : > { %2765 = vmatprep.mubr.msk.bf16.mxu0 %vm3190_vm2, %v3189_v10  ;;  %2797 = vmatprep.mubr.msk.bf16.mxu1 %vm3190_vm2, %v3189_v10 }
 0x179   : > { %2764 = vmatpush3.bf16.msra.mxu0 %v3039_v25  ;;  %2796 = vmatpush3.bf16.msra.mxu1 %v3040_v26 }
 0x17a   : > { %2769 = vmatprep.subr.bf16.mxu0 %v3189_v10  ;;  %2809 = vmatprep.subr.bf16.mxu1 %v3189_v10 }
 0x17c   : > { %2766 = vmatmul.mubr.msk.bf16.vlgmr.msra.gmra.mrb[4].mxu0 %vm718_vm1, %v3447_v24  ;;  %2798 = vmatmul.mubr.msk.bf16.vlgmr.msra.gmra.mrb[4].mxu1 %vm718_vm1, %v3447_v24 }
 0x17d   : > { %2770 = vmatpush3.bf16.msra.mxu0 %v3041_v27  ;;  %2810 = vmatpush3.bf16.msra.mxu1 %v3042_v28 }
 0x17e   : > { %2771 = vmatprep.subr.bf16.mxu0 %v3189_v10  ;;  %2811 = vmatprep.subr.bf16.mxu1 %v3189_v10 }
 0x17f   : > { %2773 = vmatprep.mubr.msk.bf16.mxu0 %vm3190_vm2, %v3189_v10  ;;  %2813 = vmatprep.mubr.msk.bf16.mxu1 %vm3190_vm2, %v3189_v10 }
 0x181   : > { %2772 = vmatpush3.bf16.msra.mxu0 %v3043_v29  ;;  %2812 = vmatpush3.bf16.msra.mxu1 %v3044_v30 }
 0x182   : > { %2785 = vmatprep.subr.bf16.mxu0 %v3189_v10  ;;  %2825 = vmatprep.subr.bf16.mxu1 %v3189_v10 }
 0x184   : > { %2774 = vmatmul.mubr.msk.bf16.vlgmr.msra.gmra.mrb[8].mxu0 %vm718_vm1, %v3447_v24  ;;  %2814 = vmatmul.mubr.msk.bf16.vlgmr.msra.gmra.mrb[8].mxu1 %vm718_vm1, %v3447_v24 }
 0x185   : > { %2786 = vmatpush3.bf16.msra.mxu0 %v3045_v31  ;;  %2826 = vmatpush3.bf16.msra.mxu1 %v3046_v32 }
 0x186   : > { %2787 = vmatprep.subr.bf16.mxu0 %v3189_v10  ;;  %2827 = vmatprep.subr.bf16.mxu1 %v3189_v10 }
 0x187   : > { %2789 = vmatprep.mubr.msk.bf16.mxu0 %vm3190_vm2, %v3189_v10  ;;  %2829 = vmatprep.mubr.msk.bf16.mxu1 %vm3190_vm2, %v3189_v10 }
 0x189   : > { %2788 = vmatpush3.bf16.msra.mxu0 %v3047_v33  ;;  %2828 = vmatpush3.bf16.msra.mxu1 %v3048_v34 }
 0x18a   : > { %2801 = vmatprep.subr.bf16.mxu0 %v3189_v10  ;;  %2841 = vmatprep.subr.bf16.mxu1 %v3189_v10 }
 0x18c   : > { %2790 = vmatmul.mubr.msk.bf16.vlgmr.msra.gmra.mrb[12].mxu0 %vm718_vm1, %v3447_v24  ;;  %2830 = vmatmul.mubr.msk.bf16.vlgmr.msra.gmra.mrb[12].mxu1 %vm718_vm1, %v3447_v24 }
 0x18d   : > { %2802 = vmatpush3.bf16.msra.mxu0 %v3049_v35  ;;  %2842 = vmatpush3.bf16.msra.mxu1 %v3050_v36 }
 0x18e   : > { %2803 = vmatprep.subr.bf16.mxu0 %v3189_v10  ;;  %2843 = vmatprep.subr.bf16.mxu1 %v3189_v10 }
 0x18f   : > { %2805 = vmatprep.mubr.msk.bf16.mxu0 %vm3190_vm2, %v3189_v10  ;;  %2845 = vmatprep.mubr.msk.bf16.mxu1 %vm3190_vm2, %v3189_v10 }
 0x191   : > { %2804 = vmatpush3.bf16.msra.mxu0 %v3051_v37  ;;  %2844 = vmatpush3.bf16.msra.mxu1 %v3052_v38 }
 0x192   : > { %2817 = vmatprep.subr.bf16.mxu0 %v3189_v10  ;;  %2855 = vmatprep.subr.bf16.mxu1 %v3189_v10 }
 0x194   : > { %2806 = vmatmul.mubr.msk.bf16.vlgmr.msra.gmra.mrb[16].mxu0 %vm718_vm1, %v3447_v24  ;;  %2846 = vmatmul.mubr.msk.bf16.vlgmr.msra.gmra.mrb[16].mxu1 %vm718_vm1, %v3447_v24 }
 0x195   : > { %2818 = vmatpush3.bf16.msra.mxu0 %v3053_v39  ;;  %2821 = vmatprep.mubr.msk.bf16.mxu0 %vm3190_vm2, %v3189_v10 }
 0x196   : > { %2819 = vmatprep.subr.bf16.mxu0 %v3189_v10  ;;  %2857 = vmatprep.mubr.msk.bf16.mxu1 %vm3190_vm2, %v3189_v10 }
 0x199   : > { %2820 = vmatpush3.bf16.msra.mxu0 %v3054_v40 }
 0x19a   : > { %2833 = vmatprep.subr.bf16.mxu0 %v3189_v10 }
 0x19c   : > { %2822 = vmatmul.mubr.msk.bf16.vlgmr.msra.gmra.mrb[20].mxu0 %vm718_vm1, %v3447_v24 }
 0x19d   : > { %2834 = vmatpush3.bf16.msra.mxu0 %v3055_v41  ;;  %2837 = vmatprep.mubr.msk.bf16.mxu0 %vm3190_vm2, %v3189_v10 }
 0x19e   : > { %2835 = vmatprep.subr.bf16.mxu0 %v3189_v10 }
 0x1a1   : > { %2836 = vmatpush3.bf16.msra.mxu0 %v3056_v42 }
 0x1a2   : > { %2849 = vmatprep.subr.bf16.mxu0 %v3189_v10 }
 0x1a4   : > { %2838 = vmatmul.mubr.msk.bf16.vlgmr.msra.gmra.mrb[24].mxu0 %vm718_vm1, %v3447_v24 }
 0x1a5   : > { %2851 = vmatprep.mubr.msk.bf16.mxu0 %vm3190_vm2, %v3189_v10 }
 0x247   : > { %v3535_v43 = vpop.f32.mrb[0].mxu0  ;;  %v1001_v44 = vpop.f32.mrb[0].mxu1 }
 0x248   : > { %v2759_v45 = vpop.f32.mrb[1].mxu0  ;;  %v2783_v46 = vpop.f32.mrb[1].mxu1  ;;  %v1426_v12 = vpack.c.bf16 %v1001_v44, %v1001_v44  ;;  %v1423_v25 = vpack.c.bf16 %v3535_v43, %v3535_v43 }
 0x249   : > { %v848_v47 = vpop.f32.mrb[2].mxu0  ;;  %v1004_v48 = vpop.f32.mrb[2].mxu1 }
 0x24a   : > { %v2760_v49 = vpop.f32.mrb[3].mxu0  ;;  %v2784_v50 = vpop.f32.mrb[3].mxu1 }
 0x24b   : > { %v1435_v49 = vlaneseq }
 0x24f   : > { %v897_v51 = vpop.f32.mrb[4].mxu0  ;;  %v1105_v52 = vpop.f32.mrb[4].mxu1 }
 0x250   : > { %v1428_v53 = vpack.c.bf16 %v1105_v52, %v1105_v52  ;;  %v2767_v54 = vpop.f32.mrb[5].mxu0  ;;  %v2799_v55 = vpop.f32.mrb[5].mxu1  ;;  %v1424_v63 = vpack.c.bf16 %v897_v51, %v897_v51 }
 0x251   : > { %v900_v56 = vpop.f32.mrb[6].mxu0  ;;  %v1108_v57 = vpop.f32.mrb[6].mxu1  ;;  %v1436_v54 = vshrl.u32 %v1435_v49, 7  ;;  %v1438_v55 = vand.u32 127, %v1435_v49 }
 0x252   : > { %v1490_v58 = vsel %vm1439_vm3, %v1428_v53, 0  ;;  %v2768_v59 = vpop.f32.mrb[7].mxu0  ;;  %v2800_v60 = vpop.f32.mrb[7].mxu1 }
 0x253   : > { %2856 = vmatpush3.bf16.xpose.msra.mxu1 %v1490_v58  ;;  %vm1624_vm5 = vcmp.gt.s32.totalorder %v1438_v55, %v1436_v54  ;;  %v1870_v54 = vld [vmem:[%s3384_s23 + $0x8] sm:$0xf] }
 0x254   : > { %2867 = vmatprep.subr.bf16.mxu1 %v3189_v10 }
 0x257   : > { %v949_v61 = vpop.f32.mrb[8].mxu0  ;;  %v1209_v62 = vpop.f32.mrb[8].mxu1 }
 0x258   : > { %v1430_v0 = vpack.c.bf16 %v1209_v62, %v1209_v62  ;;  %v2775_v2 = vpop.f32.mrb[9].mxu0  ;;  %v2815_v3 = vpop.f32.mrb[9].mxu1  ;;  %v1425_v35 = vpack.c.bf16 %v949_v61, %v949_v61 }
 0x259   : > { %v952_v4 = vpop.f32.mrb[10].mxu0  ;;  %v1212_v5 = vpop.f32.mrb[10].mxu1 }
 0x25a   : > { %v1582_v6 = vsel %vm1439_vm3, %v1430_v0, 0  ;;  %v2776_v7 = vpop.f32.mrb[11].mxu0  ;;  %v2816_v8 = vpop.f32.mrb[11].mxu1  ;;  %2858 = vmatmul.mubr.msk.bf16.vlgmr.msra.gmra.mrb[20].mxu1 %vm1439_vm3, %v1424_v63 }
 0x25b   : > { %2868 = vmatpush3.bf16.xpose.msra.mxu1 %v1582_v6  ;;  %2869 = vmatprep.mubr.msk.bf16.mxu1 %vm3190_vm2, %v3189_v10 }
 0x25c   : > { %2879 = vmatprep.subr.bf16.mxu1 %v3189_v10 }
 0x25f   : > { %v1053_v9 = vpop.f32.mrb[12].mxu0  ;;  %v1313_v11 = vpop.f32.mrb[12].mxu1 }
 0x260   : > { %v1427_v13 = vpack.c.bf16 %v1053_v9, %v1053_v9  ;;  %v1432_v14 = vpack.c.bf16 %v1313_v11, %v1313_v11  ;;  %v2791_v15 = vpop.f32.mrb[13].mxu0  ;;  %v2831_v16 = vpop.f32.mrb[13].mxu1 }
 0x261   : > { %v1056_v17 = vpop.f32.mrb[14].mxu0  ;;  %v1316_v18 = vpop.f32.mrb[14].mxu1 }
 0x262   : > { %v1444_v19 = vsel %vm1439_vm3, %v1427_v13, 0  ;;  %v1730_v20 = vsel %vm1682_vm4, %v1432_v14, 0  ;;  %v2792_v21 = vpop.f32.mrb[15].mxu0  ;;  %v2832_v22 = vpop.f32.mrb[15].mxu1  ;;  %2870 = vmatmul.mubr.msk.bf16.vlgmr.msra.gmra.mrb[24].mxu1 %vm1439_vm3, %v1426_v12 }
 0x263   : > { %2850 = vmatpush3.bf16.xpose.msra.mxu0 %v1444_v19  ;;  %2880 = vmatpush3.bf16.msra.mxu1 %v1730_v20 }
 0x264   : > { %2861 = vmatprep.subr.bf16.mxu0 %v3189_v10  ;;  %2881 = vmatprep.mubr.msk.bf16.mxu1 %vm3190_vm2, %v3189_v10 }
 0x265   : > { %2891 = vmatprep.subr.bf16.mxu1 %v3189_v10 }
 0x267   : > { %v1157_v23 = vpop.f32.mrb[16].mxu0  ;;  %v3551_v24 = vpop.f32.mrb[16].mxu1 }
 0x268   : > { %v1429_v26 = vpack.c.bf16 %v1157_v23, %v1157_v23  ;;  %v2807_v27 = vpop.f32.mrb[17].mxu0  ;;  %v2847_v28 = vpop.f32.mrb[17].mxu1 }
 0x269   : > { %v1160_v29 = vpop.f32.mrb[18].mxu0  ;;  %v1420_v30 = vpop.f32.mrb[18].mxu1 }
 0x26a   : > { %v1536_v31 = vsel %vm1439_vm3, %v1429_v26, 0  ;;  %v2808_v32 = vpop.f32.mrb[19].mxu0  ;;  %v2848_v33 = vpop.f32.mrb[19].mxu1  ;;  %2852 = vmatmul.mubr.msk.bf16.vlgmr.msra.gmra.mrb[28].mxu0 %vm1439_vm3, %v1423_v25 }
 0x26b   : > { %2862 = vmatpush3.bf16.xpose.msra.mxu0 %v1536_v31  ;;  %2863 = vmatprep.mubr.msk.bf16.mxu0 %vm3190_vm2, %v3189_v10 }
 0x26c   : > { %2873 = vmatprep.subr.bf16.mxu0 %v3189_v10 }
 0x26f   : > { %v1261_v34 = vpop.f32.mrb[20].mxu0 }
 0x270   : > { %v1431_v36 = vpack.c.bf16 %v1261_v34, %v1261_v34  ;;  %v2823_v37 = vpop.f32.mrb[21].mxu0 }
 0x271   : > { %v1264_v38 = vpop.f32.mrb[22].mxu0 }
 0x272   : > { %v1684_v39 = vsel %vm1682_vm4, %v1431_v36, 0  ;;  %v2824_v40 = vpop.f32.mrb[23].mxu0  ;;  %2864 = vmatmul.mubr.msk.bf16.vlgmr.msra.gmra.mrb[32].mxu0 %vm1439_vm3, %v1425_v35 }
 0x273   : > { %2874 = vmatpush3.bf16.msra.mxu0 %v1684_v39  ;;  %2875 = vmatprep.mubr.msk.bf16.mxu0 %vm3190_vm2, %v3189_v10  ;;  %v1434_v40 = vpack.c.bf16 %v3551_v24, %v3551_v24  ;;  %v1868_v24 = vld [vmem:[%s3384_s23] sm:$0xf] }
 0x274   : > { %2885 = vmatprep.subr.bf16.mxu0 %v3189_v10 }
 0x277   : > { %v3565_v41 = vpop.f32.mrb[24].mxu0 }
 0x278   : > { %v2839_v42 = vpop.f32.mrb[25].mxu0  ;;  %v1433_v36 = vpack.c.bf16 %v3565_v41, %v3565_v41 }
 0x279   : > { %v1368_v43 = vpop.f32.mrb[26].mxu0 }
 0x27a   : > { %v2840_v44 = vpop.f32.mrb[27].mxu0  ;;  %v1776_v42 = vsel %vm1682_vm4, %v1433_v36, 0  ;;  %v2648_v36 = vld [vmem:[%s3814_s25] ss:$0 sm:$0xff] }
 0x32d   : > { %v1526_v45 = vpop.f32.mrb[20].mxu1 }
 0x32e   : > { %v2859_v46 = vpop.f32.mrb[21].mxu1  ;;  %v1628_v61 = vsel %vm1624_vm5, -1e+30, %v1526_v45 }
 0x32f   : > { %v1529_v47 = vpop.f32.mrb[22].mxu1  ;;  %v1634_v63 = vsel %vm1439_vm3, %v1628_v61, -inf  ;;  %v1822_v46 = vsel %vm1682_vm4, %v1434_v40, 0 }
 0x330   : > { %v2860_v48 = vpop.f32.mrb[23].mxu1 }
 0x335   : > { %v1618_v50 = vpop.f32.mrb[24].mxu1 }
 0x336   : > { %v2871_v51 = vpop.f32.mrb[25].mxu1  ;;  %v1630_v0 = vsel %vm1624_vm5, -1e+30, %v1618_v50  ;;  %v1876_v50 = vsel %vm1682_vm4, %v1868_v24, 0 }
 0x337   : > { %v1621_v52 = vpop.f32.mrb[26].mxu1  ;;  %v1640_v6 = vsel %vm1439_vm3, %v1630_v0, -inf }
 0x338   : > { %v2872_v53 = vpop.f32.mrb[27].mxu1  ;;  %v1869_v52 = vld [vmem:[%s3384_s23 + $0x4] sm:$0xf] }
 0x339   : > { %v1922_v53 = vsel %vm1682_vm4, %v1869_v52, 0 }
 0x33d   : > { %v1480_v56 = vpop.f32.mrb[28].mxu0 }
 0x33e   : > { %v1627_v57 = vsel %vm1624_vm5, -1e+30, %v1480_v56  ;;  %v2853_v58 = vpop.f32.mrb[29].mxu0 }
 0x33f   : > { %v1483_v59 = vpop.f32.mrb[30].mxu0  ;;  %v1631_v60 = vsel %vm1439_vm3, %v1627_v57, -inf  ;;  %v1968_v58 = vsel %vm1682_vm4, %v1870_v54, 0 }
 0x340   : > { %1632 = vmax.xlane.f32.xlu1 %v1631_v60  ;;  %v2854_v62 = vpop.f32.mrb[31].mxu0  ;;  %v1871_v60 = vld [vmem:[%s3384_s23 + $0xc] sm:$0xf] }
 0x344   : > { %1635 = vmax.xlane.f32.xlu1 %v1634_v63 }
 0x345   : > { %v1572_v2 = vpop.f32.mrb[32].mxu0 }
 0x346   : > { %v1629_v3 = vsel %vm1624_vm5, -1e+30, %v1572_v2  ;;  %v2865_v4 = vpop.f32.mrb[33].mxu0  ;;  %v2014_v2 = vsel %vm1682_vm4, %v1871_v60, 0 }
 0x347   : > { %v1575_v5 = vpop.f32.mrb[34].mxu0  ;;  %v1637_v7 = vsel %vm1439_vm3, %v1629_v3, -inf }
 0x348   : > { %1641 = vmax.xlane.f32.xlu1 %v1640_v6  ;;  %1638 = vmax.xlane.f32.xlu0 %v1637_v7  ;;  %v2866_v8 = vpop.f32.mrb[35].mxu0 }
 0x3cd   : > { %v1633_v9 = vpop.xlane.xlu1 %1632 }
 0x3ce   : > { %v1643_v11 = vsub.f32 %v1627_v57, %v1633_v9 }
 0x3d0   : > { %v1647_v12 = vmul.f32 1.442695, %v1643_v11 }
 0x3d1   : > { %v1636_v13 = vpop.xlane.xlu1 %1635 }
 0x3d2   : > { %3069 = vpow2.f32 %v1647_v12  ;;  %v1644_v14 = vsub.f32 %v1628_v61, %v1636_v13 }
 0x3d4   : > { %v1649_v15 = vmul.f32 1.442695, %v1644_v14 }
 0x3d5   : > { %v1642_v16 = vpop.xlane.xlu1 %1641  ;;  %v1639_v17 = vpop.xlane.xlu0 %1638 }
 0x3d6   : > { %3071 = vpow2.f32 %v1649_v15  ;;  %v1646_v18 = vsub.f32 %v1630_v0, %v1642_v16  ;;  %v1645_v19 = vsub.f32 %v1629_v3, %v1639_v17 }
 0x3d8   : > { %v1653_v20 = vmul.f32 1.442695, %v1646_v18  ;;  %v1651_v21 = vmul.f32 1.442695, %v1645_v19 }
 0x3da   : > { %3073 = vpow2.f32 %v1653_v20 }
 0x3db   : > { %3075 = vpow2.f32 %v1651_v21 }
 0x3dc   : > { %v3070_v22 = vpop.eup %3069 }
 0x3dd   : > { %v1655_v23 = vsel %vm1439_vm3, %v3070_v22, 0.0 }
 0x3de   : > { %1656 = vadd.xlane.f32.xlu0 %v1655_v23 }
 0x3e0   : > { %v3072_v25 = vpop.eup %3071 }
 0x3e1   : > { %v1658_v26 = vsel %vm1439_vm3, %v3072_v25, 0.0 }
 0x3e2   : > { %1659 = vadd.xlane.f32.xlu1 %v1658_v26 }
 0x3e4   : > { %v3074_v27 = vpop.eup %3073 }
 0x3e5   : > { %v3076_v28 = vpop.eup %3075  ;;  %v1664_v29 = vsel %vm1439_vm3, %v3074_v27, 0.0 }
 0x3e6   : > { %1665 = vadd.xlane.f32.xlu1 %v1664_v29  ;;  %v1661_v30 = vsel %vm1439_vm3, %v3076_v28, 0.0 }
 0x3e7   : > { %1662 = vadd.xlane.f32.xlu0 %v1661_v30 }
 0x46b   : > { %v1657_v31 = vpop.xlane.xlu0 %1656 }
 0x46c   : > { %3077 = vrcp.f32 %v1657_v31 }
 0x46f   : > { %v1660_v32 = vpop.xlane.xlu1 %1659 }
 0x470   : > { %3079 = vrcp.f32 %v1660_v32 }
 0x473   : > { %v1666_v33 = vpop.xlane.xlu1 %1665 }
 0x474   : > { %3081 = vrcp.f32 %v1666_v33  ;;  %v1663_v34 = vpop.xlane.xlu0 %1662 }
 0x475   : > { %3083 = vrcp.f32 %v1663_v34 }
 0x476   : > { %v3078_v35 = vpop.eup %3077 }
 0x477   : > { %v1671_v37 = vmul.f32 %v3078_v35, %v3070_v22 }
 0x479   : > { %v1675_v38 = vpack.c.bf16 %v1671_v37, %v1671_v37 }
 0x47a   : > { %v3080_v39 = vpop.eup %3079 }
 0x47b   : > { %v1672_v43 = vmul.f32 %v3080_v39, %v3072_v25  ;;  %2876 = vmatmul.mubr.msk.bf16.vlgmr.msra.gmra.mrb[36].mxu0 %vm1439_vm3, %v1675_v38 }
 0x47c   : > { %2886 = vmatpush3.bf16.msra.mxu0 %v1776_v42  ;;  %2887 = vmatprep.mubr.msk.bf16.mxu0 %vm3190_vm2, %v3189_v10 }
 0x47d   : > { %v1676_v44 = vpack.c.bf16 %v1672_v43, %v1672_v43  ;;  %2897 = vmatprep.subr.bf16.mxu0 %v3189_v10 }
 0x47e   : > { %v3082_v41 = vpop.eup %3081 }
 0x47f   : > { %v3084_v45 = vpop.eup %3083  ;;  %2882 = vmatmul.mubr.msk.bf16.vlgmr.msra.gmra.mrb[28].mxu1 %vm1439_vm3, %v1676_v44  ;;  %v1674_v48 = vmul.f32 %v3082_v41, %v3074_v27 }
 0x480   : > { %v1673_v47 = vmul.f32 %v3084_v45, %v3076_v28  ;;  %2892 = vmatpush3.bf16.msra.mxu1 %v1822_v46  ;;  %2893 = vmatprep.mubr.msk.bf16.mxu1 %vm3190_vm2, %v3189_v10 }
 0x481   : > { %2903 = vmatprep.subr.bf16.mxu1 %v3189_v10  ;;  %v1678_v51 = vpack.c.bf16 %v1674_v48, %v1674_v48  ;;  %v3057_v48 = vld [vmem:[%s3397_s14] sm:$0xff]  }
 0x482   : > { %v1677_v49 = vpack.c.bf16 %v1673_v47, %v1673_v47 }
 0x484   : > { %2888 = vmatmul.mubr.msk.bf16.vlgmr.msra.gmra.mrb[40].mxu0 %vm1439_vm3, %v1677_v49  ;;  %v3058_v49 = vld [vmem:[%s3397_s14 + $0x8] sm:$0xff]  }
 0x485   : > { %2898 = vmatpush3.bf16.msra.mxu0 %v1876_v50  ;;  %2899 = vmatprep.mubr.msk.bf16.mxu0 %vm3190_vm2, %v3189_v10  ;;  %v3060_v50 = vld [vmem:[%s3411_s16 + $0x8] sm:$0xff]  }
 0x486   : > { %2909 = vmatprep.subr.bf16.mxu0 %v3189_v10 }
 0x487   : > { %2894 = vmatmul.mubr.msk.bf16.vlgmr.msra.gmra.mrb[32].mxu1 %vm1439_vm3, %v1678_v51  ;;  %v3061_v51 = vld [vmem:[%s3411_s16 + $0x10] sm:$0xff]  }
 0x488   : > { %2905 = vmatprep.mubr.msk.bf16.mxu1 %vm3190_vm2, %v3189_v10  ;;  %2904 = vmatpush3.bf16.msra.mxu1 %v1922_v53 }
 0x489   : > { %2915 = vmatprep.subr.bf16.mxu1 %v3189_v10 }
 0x54e   : > { %v1720_v55 = vpop.f32.mrb[36].mxu0 }
 0x54f   : > { %v1864_v56 = vpack.c.bf16 %v1720_v55, %v1720_v55  ;;  %v2877_v57 = vpop.f32.mrb[37].mxu0 }
 0x550   : > { %v1723_v59 = vpop.f32.mrb[38].mxu0 }
 0x551   : > { %v2878_v61 = vpop.f32.mrb[39].mxu0  ;;  %2900 = vmatmul.mubr.msk.bf16.vlgmr.msra.gmra.mrb[44].mxu0 %vm1439_vm3, %v1864_v56  ;;  %v2649_v56 = vld [vmem:[%s3815_s20] ss:$0 sm:$0xff] }
 0x552   : > { %v1766_v62 = vpop.f32.mrb[28].mxu1  ;;  %2910 = vmatpush3.bf16.msra.mxu0 %v1968_v58  ;;  %2911 = vmatprep.mubr.msk.bf16.mxu0 %vm3190_vm2, %v3189_v10  ;;  %v2650_v58 = vld [vmem:[%s690_s28] ss:$0 sm:$0xff] }
 0x553   : > { %v1865_v63 = vpack.c.bf16 %v1766_v62, %v1766_v62  ;;  %v2883_v0 = vpop.f32.mrb[29].mxu1  ;;  %2921 = vmatprep.subr.bf16.mxu0 %v3189_v10  ;;  %v3062_v62 = vld [vmem:[%s3411_s16 + $0x18] sm:$0xff]  }
 0x554   : > { %v1769_v3 = vpop.f32.mrb[30].mxu1  ;;  %v3064_v0 = vld [vmem:[%s3411_s16 + $0x28] sm:$0xff]  }
 0x555   : > { %v2884_v4 = vpop.f32.mrb[31].mxu1  ;;  %2906 = vmatmul.mubr.msk.bf16.vlgmr.msra.gmra.mrb[36].mxu1 %vm1439_vm3, %v1865_v63  ;;  %v3063_v63 = vld [vmem:[%s3411_s16 + $0x20] sm:$0xff]   ;;  %v3066_v3 = vld [vmem:[%s3411_s16 + $0x38] sm:$0xff]  }
 0x556   : > { %2916 = vmatpush3.bf16.msra.mxu1 %v2014_v2  ;;  %2917 = vmatprep.mubr.msk.bf16.mxu1 %vm3190_vm2, %v3189_v10  ;;  %v3065_v2 = vld [vmem:[%s3411_s16 + $0x30] sm:$0xff]   ;;  %v2651_v4 = vld [vmem:[%s698_s19] ss:$0 sm:$0xff]  ;;  %s3816_s19 = sld [smem:[#allocation9_spill]] }
 0x557   : > { %v1812_v5 = vpop.f32.mrb[40].mxu0  ;;  %2929 = vmatprep.subr.bf16.mxu1 %v3189_v10 }
 0x558   : > { %v1866_v6 = vpack.c.bf16 %v1812_v5, %v1812_v5  ;;  %v2889_v7 = vpop.f32.mrb[41].mxu0 }
 0x559   : > { %v1815_v8 = vpop.f32.mrb[42].mxu0 }
 0x55a   : > { %v2890_v9 = vpop.f32.mrb[43].mxu0  ;;  %2912 = vmatmul.mubr.msk.bf16.vlgmr.msra.gmra.mrb[48].mxu0 %vm1439_vm3, %v1866_v6  ;;  %v1858_v11 = vpop.f32.mrb[32].mxu1 }
 0x55b   : > { %v1867_v12 = vpack.c.bf16 %v1858_v11, %v1858_v11  ;;  %v2895_v13 = vpop.f32.mrb[33].mxu1  ;;  %2925 = vmatprep.mubr.msk.bf16.mxu0 %vm3190_vm2, %v3189_v10  ;;  %2922 = vmatpush3.bf16.msra.mxu0 %v3057_v48 }
 0x55c   : > { %v1861_v14 = vpop.f32.mrb[34].mxu1  ;;  %2923 = vmatprep.subr.bf16.mxu0 %v3189_v10  ;;  %p2664_p1 = scmp.ne.s32.totalorder %s3816_s19, 1 }
 0x55d   : > { %v2896_v15 = vpop.f32.mrb[35].mxu1  ;;  %2918 = vmatmul.mubr.msk.bf16.vlgmr.msra.gmra.mrb[40].mxu1 %vm1439_vm3, %v1867_v12  ;;  %s3817_s15 = sld [smem:[#allocation24_spill]] (!%p2664_p1)  ;;  %vm3192_vm6 = vmmov (!%p2664_p1), 0   ;;  %s3818_s17 = sld [smem:[#allocation22_spill]] (!%p2664_p1) }
 0x55e   : > { %2945 = vmatprep.mubr.msk.bf16.mxu1 %vm3190_vm2, %v3189_v10  ;;  %s3819_s14 = sld [smem:[#allocation23_spill]] (!%p2664_p1)  ;;  %s3820_s0 = sld [smem:[#allocation25_spill]] (!%p2664_p1) }
 0x55f   : > { %2924 = vmatpush3.bf16.msra.mxu0 %v3058_v49 }
 0x624   : > { %v1912_v16 = vpop.f32.mrb[44].mxu0 }
 0x625   : > { %v2901_v17 = vpop.f32.mrb[45].mxu0  ;;  %v2056_v21 = vsel %vm718_vm1, %v1912_v16, 0.0  ;;  %v2655_v16 = vld [vmem:[%s706_s4] ss:$0 sm:$0xff] }
 0x626   : > { %v1915_v18 = vpop.f32.mrb[46].mxu0 }
 0x627   : > { %v2902_v19 = vpop.f32.mrb[47].mxu0 }
 0x628   : > { %v1958_v20 = vpop.f32.mrb[36].mxu1 }
 0x629   : > { %v2057_v22 = vsel %vm718_vm1, %v1958_v20, 0.0  ;;  %v2907_v23 = vpop.f32.mrb[37].mxu1 }
 0x62a   : > { %v2058_v25 = vadd.f32 %v2057_v22, %v2056_v21  ;;  %v1961_v26 = vpop.f32.mrb[38].mxu1 }
 0x62b   : > { %v2908_v27 = vpop.f32.mrb[39].mxu1 }
 0x62d   : > { %v2004_v28 = vpop.f32.mrb[48].mxu0 }
 0x62e   : > { %v2059_v29 = vsel %vm718_vm1, %v2004_v28, 0.0  ;;  %v2913_v30 = vpop.f32.mrb[49].mxu0 }
 0x62f   : > { %v2060_v31 = vadd.f32 %v2059_v29, %v2058_v25  ;;  %v2007_v32 = vpop.f32.mrb[50].mxu0  ;;  %v3089_v30 = vld [vmem:[%s3817_s15] sm:$0xff] (!%p2664_p1)  }
 0x630   : > { %v2914_v33 = vpop.f32.mrb[51].mxu0  ;;  %v2050_v34 = vpop.f32.mrb[40].mxu1  ;;  %v3090_v32 = vld [vmem:[%s3817_s15 + $0x8] sm:$0xff] (!%p2664_p1)  }
 0x631   : > { %v2061_v35 = vsel %vm718_vm1, %v2050_v34, 0.0  ;;  %v2919_v37 = vpop.f32.mrb[41].mxu1 }
 0x632   : > { %v2062_v38 = vadd.f32 %v2061_v35, %v2060_v31  ;;  %v2053_v39 = vpop.f32.mrb[42].mxu1  ;;  %v3191_v31 = vmov (!%p2664_p1), 0.0   ;;  %v2665_v37 = vld [vmem:[%s3818_s17] ss:$0 sm:$0xff] (!%p2664_p1) }
 0x633   : > { %v2920_v40 = vpop.f32.mrb[43].mxu1  ;;  %2949 = vmatprep.subr.bf16.mxu0 (!%p2664_p1), %v3191_v31  ;;  %v2666_v39 = vld [vmem:[%s3819_s14] ss:$0 sm:$0xff] (!%p2664_p1) }
 0x634   : > { %v2070_v42 = vadd.f32 %v2648_v36, %v2062_v38 }
 0x636   : > { %v3629_v43 = vadd.f32 %v2070_v42, %v3415_v1  ;;  %v3059_v1 = vld [vmem:[%s3411_s16] sm:$0xff]  }
 0x637   : > { %2930 = vmatpush3.bf16.msra.mxu1 %v3059_v1 }
 0x638   : > { %v2074_v44 = vsel %vm718_vm1, %v3629_v43, 0.0  ;;  %2931 = vmatprep.subr.bf16.mxu1 %v3189_v10 }
 0x639   : > { %2075 = vadd.xlane.f32.xlu0 %v2074_v44  ;;  %v2667_v44 = vld [vmem:[%s3820_s0] ss:$0 sm:$0xff] (!%p2664_p1) }
 0x63b   : > { %2932 = vmatpush3.bf16.msra.mxu1 %v3060_v50 }
 0x63c   : > { %2933 = vmatprep.subr.bf16.mxu1 %v3189_v10 }
 0x63f   : > { %2934 = vmatpush3.bf16.msra.mxu1 %v3061_v51 }
 0x640   : > { %2935 = vmatprep.subr.bf16.mxu1 %v3189_v10 }
 0x643   : > { %2936 = vmatpush3.bf16.msra.mxu1 %v3062_v62 }
 0x644   : > { %2937 = vmatprep.subr.bf16.mxu1 %v3189_v10 }
 0x647   : > { %2938 = vmatpush3.bf16.msra.mxu1 %v3063_v63 }
 0x648   : > { %2939 = vmatprep.subr.bf16.mxu1 %v3189_v10 }
 0x64b   : > { %2940 = vmatpush3.bf16.msra.mxu1 %v3064_v0 }
 0x64c   : > { %2941 = vmatprep.subr.bf16.mxu1 %v3189_v10 }
 0x64f   : > { %2942 = vmatpush3.bf16.msra.mxu1 %v3065_v2 }
 0x650   : > { %2943 = vmatprep.subr.bf16.mxu1 %v3189_v10 }
 0x653   : > { %2944 = vmatpush3.bf16.msra.mxu1 %v3066_v3 }
 0x6c6   : > { %v2076_v41 = vpop.xlane.xlu0 %2075 }
 0x6c7   : > { %v2077_v45 = vmul.f32 0.03125, %v2076_v41 }
 0x6c9   : > { %v2078_v46 = vsub.f32 %v3629_v43, %v2077_v45 }
 0x6cb   : > { %v2079_v24 = vmul.f32 %v2078_v46, %v2078_v46 }
 0x6cd   : > { %v2080_v47 = vsel %vm718_vm1, %v2079_v24, 0.0 }
 0x6ce   : > { %2081 = vadd.xlane.f32.xlu1 %v2080_v47 }
 0x75b   : > { %v2082_v52 = vpop.xlane.xlu1 %2081 }
 0x75c   : > { %v2083_v53 = vmul.f32 0.03125, %v2082_v52 }
 0x75e   : > { %v2084_v54 = vadd.f32 1e-05, %v2083_v53 }
 0x760   : > { %3085 = vrsqrt.f32 %v2084_v54 }
 0x76a   : > { %v3086_v55 = vpop.eup %3085 }
 0x76b   : > { %v2086_v57 = vmul.f32 %v3086_v55, %v2078_v46 }
 0x76d   : > { %v2093_v59 = vmul.f32 %v2649_v56, %v2086_v57 }
 0x76f   : > { %v2100_v60 = vadd.f32 %v2650_v58, %v2093_v59 }
 0x771   : > { %v2101_v61 = vpack.c.bf16 %v2100_v60, %v2100_v60 }
 0x773   : > { %2926 = vmatmul.mubr.msk.bf16.vlgmr.msra.gmra.mrb[52].mxu0 %vm718_vm1, %v2101_v61 }
 0x774   : > { %2953 = vmatprep.mubr.msk.bf16.mxu0 (!%p2664_p1), %vm3192_vm6, %v3191_v31  ;;  %2950 = vmatpush3.bf16.msra.mxu0 (!%p2664_p1), %v3089_v30 }
 0x775   : > { %2951 = vmatprep.subr.bf16.mxu0 (!%p2664_p1), %v3191_v31 }
 0x778   : > { %2952 = vmatpush3.bf16.msra.mxu0 (!%p2664_p1), %v3090_v32 }
 0x846   : > { %v2162_v5 = vpop.f32.mrb[52].mxu0 }
 0x847   : > { %v2163_v6 = vadd.f32 %v2651_v4, %v2162_v5  ;;  %v2927_v7 = vpop.f32.mrb[53].mxu0 }
 0x848   : > { %v2165_v8 = vpop.f32.mrb[54].mxu0 }
 0x849   : > { %v2169_v9 = vmul.f32 0.70710677, %v2163_v6  ;;  %v2928_v11 = vpop.f32.mrb[55].mxu0  ;;  %v2168_v13 = vmul.f32 0.5, %v2163_v6 }
 0x84b   : > { %3087 = verf.f32 %v2169_v9 }
 0x855   : > { %v3088_v12 = vpop.eup %3087 }
 0x856   : > { %v2171_v14 = vadd.f32 1.0, %v3088_v12 }
 0x858   : > { %v2172_v15 = vmul.f32 %v2171_v14, %v2168_v13 }
 0x85a   : > { %v2173_v10 = vpack.c.bf16 %v2172_v15, %v2172_v15 }
 0x85c   : > { %2946 = vmatmul.mubr.bf16.vlgmr.msra.gmra.mrb[44].mxu1 %v2173_v10 }
 0x92e   : > { %2290 = sbr.rel (%p2664_p1) target bundleno = 2886 (0xb46), region = 92 }
 0x92f   : > { %v2279_v17 = vpop.f32.mrb[44].mxu1 }
 0x930   : > { %v2280_v18 = vadd.f32 %v2655_v16, %v2279_v17  ;;  %v2947_v19 = vpop.f32.mrb[45].mxu1 }
 0x931   : > { %v2282_v20 = vpop.f32.mrb[46].mxu1 }
 0x932   : > { %v2285_v21 = vadd.f32 %v2280_v18, %v3629_v43  ;;  %v2948_v22 = vpop.f32.mrb[47].mxu1 }
 0x934   : > { %2286 = vst.msk [vmem:[#allocation2] sm:$0xff] %vm718_vm1, %v2285_v21  ;;  %v2293_v23 = vsel (!%p2664_p1), %vm718_vm1, %v2285_v21, 0.0 }
 0x935   : > { %2294 = vadd.xlane.f32.xlu0 %v2293_v23 }
 0x9c2   : > { %v2295_v25 = vpop.xlane.xlu0 %2294 }
 0x9c3   : > { %v2296_v26 = vmul.f32 0.03125, %v2295_v25 }
 0x9c5   : > { %v2297_v27 = vsub.f32 %v2285_v21, %v2296_v26 }
 0x9c7   : > { %v2298_v28 = vmul.f32 %v2297_v27, %v2297_v27 }
 0x9c9   : > { %v2299_v29 = vsel %vm718_vm1, %v2298_v28, 0.0 }
 0x9ca   : > { %2300 = vadd.xlane.f32.xlu0 %v2299_v29 }
 0xa57   : > { %v2301_v33 = vpop.xlane.xlu0 %2300 }
 0xa58   : > { %v2302_v34 = vmul.f32 0.03125, %v2301_v33 }
 0xa5a   : > { %v2303_v35 = vadd.f32 1e-05, %v2302_v34 }
 0xa5c   : > { %3091 = vrsqrt.f32 %v2303_v35 }
 0xa66   : > { %v3092_v36 = vpop.eup %3091 }
 0xa67   : > { %v2305_v38 = vmul.f32 %v3092_v36, %v2297_v27 }
 0xa69   : > { %v2312_v40 = vmul.f32 %v2665_v37, %v2305_v38 }
 0xa6b   : > { %v2319_v42 = vadd.f32 %v2666_v39, %v2312_v40 }
 0xa6d   : > { %v2320_v43 = vpack.c.bf16 %v2319_v42, %v2319_v42 }
 0xa6f   : > { %2954 = vmatmul.mubr.msk.bf16.vlgmr.msra.gmra.mrb[0].mxu0 %vm718_vm1, %v2320_v43 }
 0xb42   : > { %v2381_v41 = vpop.f32.mrb[0].mxu0 }
 0xb43   : > { %v2382_v45 = vadd.f32 %v2667_v44, %v2381_v41  ;;  %v2955_v46 = vpop.f32.mrb[1].mxu0 }
 0xb44   : > { %v2384_v24 = vpop.f32.mrb[2].mxu0 }
 0xb45   : > { %2387 = vst [vmem:[%s661_s22] sm:$0xff] %v2382_v45  ;;  %v2956_v47 = vpop.f32.mrb[3].mxu0 }
 0xb46 PF: > { %s3821_s29 = sld [smem:[#allocation10_spill]]  ;;  %s3822_s28 = sld [smem:[#allocation7_spill]] }
 0xb47   : > { %s3824_s4 = sld [smem:[#allocation26_spill]]  ;;  %s2402_s30 = sshll.u32 %s661_s22, 4  ;;  %s2403_s30 = int_to_ptr.vmem [resolvable:$true] %s2402_s30 }
 0xb48   : > { %s3093_s24 = scalar_lea.vmem %s2403_s30, 128  ;;  %s3193_s17 = smov [#allocation3]  }
 0xb49   : > { %p3094_p2 = scmp.ne.s32.totalorder %s2403_s30, %s3093_s24  ;;  %s3097_s23 = sshll.u32 %s3193_s17, 4  ;;  %s3098_s23 = int_to_ptr.vmem [resolvable:$false] %s3097_s23 }
 0xb4a   : > { %s3099_s25 = scalar_lea.vmem %s3098_s23, 256  ;;  %p3100_p6 = scmp.lt.s32.totalorder %s2403_s30, %s3098_s23 }
 0xb4b   : > { %p3095_p4 = pnand %p3094_p2, %p3328_p3  ;;  %p3101_p7 = scmp.lt.s32.totalorder %s3099_s25, %s3093_s24 }
 0xb4c   : > { %s2672_s16 = sshll.u32 %s3821_s29, 7  ;;  %s3825_s12 = sand.u32 1, %s3822_s28  }
 0xb4d   : > { %s3701_s21 = scalar_lea.hbm %s3824_s4, %s2672_s16  ;;  %s2389_s13 = scalar_lea.sflag [#allocation4], %s3825_s12 }
 0xb4e   : > { %p3096_p5 = pneg %p3095_p4  ;;  %p3102_p8 = por %p3101_p7, %p3100_p6 }
 0xb50   : > { %p3103_p10 = pnand %p3102_p8, %p3096_p5 }
 0xb52   : > { %3106 = shalt.err (!%p3103_p10)
}
 0xb53   : > { %s3107_s26 = scalar_lea.hbm %s3701_s21, 128  ;;  %s3111_s27 = scalar_lea.hbm %s3824_s4, 256 }
 0xb54   : > { %p3108_p11 = scmp.ne.s32.totalorder %s3701_s21, %s3107_s26  ;;  %p3112_p0 = scmp.lt.u32.totalorder %s3701_s21, %s3824_s4 }
 0xb55   : > { %p3113_p1 = scmp.lt.u32.totalorder %s3111_s27, %s3107_s26  ;;  %p3115_p4 = scmp.lt.u32.totalorder %s3107_s26, %s3701_s21 }
 0xb56   : > { %p3109_p12 = pnand %p3108_p11, %p3328_p3 }
 0xb57   : > { %p3114_p2 = por %p3113_p1, %p3112_p0 }
 0xb58   : > { %p3110_p13 = pneg %p3109_p12 }
 0xb59   : > { %p3116_p5 = por %p3115_p4, %p3114_p2 }
 0xb5b   : > { %p3117_p6 = pnand %p3116_p5, %p3110_p13 }
 0xb5d   : > { %3120 = shalt.err (!%p3117_p6)
}
 0xb5e   : > { %2958 = dma.vmem_to_hbm [thread:$0]  (%p3328_p3), %s2403_s30, 128, %s3701_s21, %s2389_s13  }
 0xb5f PF: > { %s3826_s29 = sld [smem:[#allocation13_spill]]  ;;  %s3827_s28 = sld [smem:[#allocation6_spill]] }
 0xb65   : > { %p2964_p7 = scmp.ge.s32.totalorder %s3826_s29, 2  ;;  %s2414_s3 = sand.u32 1, %s3827_s28  }
 0xb66   : > { %s2415_s19 = scalar_lea.sflag [#allocation4], %s2414_s3 }
 0xb67   : > { %p2961_p8 = pnand %p2964_p7, %p3338_p9 }
 0xb69   : > { %3154 = dma.done.wait (!%p2961_p8), %s2415_s19, 128  }
 0xb6a   : > { %3156 = vsyncadd (!%p2961_p8), %s2415_s19, 4294967168  ;;  %s29_s28 = sadd.s32 1, %s3826_s29   ;;  %s3829_s21 = sld [smem:[#allocation7_spill]] }
 0xb6b   : > { %p26_p10 = scmp.ge.s32.totalorder %s29_s28, 6   ;;  %s3830_s22 = sld [smem:[#allocation8_spill]] }
 0xb6c   : > { %s3831_s23 = sld [smem:[#allocation18_spill]]  ;;  %s3832_s24 = sld [smem:[#allocation11_spill]] }
 0xb6d   : > { %s3833_s25 = sld [smem:[#allocation12_spill]]  ;;  %s3834_s26 = sld [smem:[#allocation14_spill]] }
 0xb6e   : > { %s3835_s27 = sld [smem:[#allocation16_spill]]  ;;  %28 = sbr.rel (!%p26_p10) target bundleno = 14 (0xe), region = 160 }
 0xb75   :  { %2420 = vsyncpa [#allocation4], 1 }
 0xb76   :  { %2422 = vsyncpa [#allocation4 + $0x1], 1 }

</bundles_post_ra>
